<compile_context>
chip_gen: v7x
topology: tpu7x:2x2x1
jax: 0.10.0
libtpu: 0.0.40
codegen_flags: <defaults>
</compile_context>

<pallas_src>
import functools

import jax
import jax.numpy as jnp
from jax import lax
from jax.experimental import pallas as pl
from jax.experimental.pallas import tpu as pltpu

KERNEL_SIZES = (3, 4, 5)
NUM_FILTERS = 100
LANE = 128
SUBLANE = 8


def _round_up(n, m):
    return -(-n // m) * m


def textcnn_kernel(x_ref, w_ref, b_ref, fcw_ref, fcb_ref, out_ref, *,
                   time_rows, louts, f_pad):
    """One grid step processes TB (sublane-aligned) batch rows.

    x_ref:   (TB, L_pad, E_pad)       activations (f32 or bf16), zero padded
    w_ref:   (K_MAX, E_pad, 3*F_pad)  per-tap conv weights fused over kernel sizes
    b_ref:   (1, 3*F_pad)             fused conv bias (f32)
    fcw_ref: (3*F_pad, C_pad)         fused FC weight
    fcb_ref: (1, C_pad)               FC bias (f32)
    out_ref: (TB, C_pad)              logits (f32; padded classes are 0)
    """
    tb, _, e_pad = x_ref.shape
    k_max, _, nf = w_ref.shape

    # Per-tap MXU accumulation — no materialized im2col window.  Each tap is one
    # (TB*T, E_pad) @ (E_pad, 3*F_pad) matmul into a single f32 accumulator.
    acc = None
    for i in range(k_max):
        xi = x_ref[:, pl.ds(i, time_rows), :].reshape(tb * time_rows, e_pad)
        part = jnp.dot(xi, w_ref[i], preferred_element_type=jnp.float32)
        acc = part if acc is None else acc + part

    act = jnp.maximum(acc + b_ref[...], 0.0)                 # bias + ReLU (f32)
    act = act.reshape(tb, time_rows, nf)                     # aligned -> free reshape

    # Mask padded / invalid time rows to 0 per kernel-size block before the pool.
    # Mandatory: padded window rows evaluate to relu(bias) > 0; zeroing is exact
    # because every valid ReLU output is >= 0.
    t_idx = lax.broadcasted_iota(jnp.int32, (time_rows, nf), 0)
    col = lax.broadcasted_iota(jnp.int32, (time_rows, nf), 1)
    limit = jnp.full((time_rows, nf), louts[-1], jnp.int32)
    for j, lo in enumerate(louts[:-1]):
        in_blk = (col >= j * f_pad) & (col < (j + 1) * f_pad)
        limit = jnp.where(in_blk, lo, limit)
    act = jnp.where((t_idx < limit)[None], act, 0.0)

    pooled = jnp.max(act, axis=1)                            # max over time -> (TB, 3*F_pad)

    # Fused FC: single (TB, 3*F_pad) @ (3*F_pad, C_pad) matmul (the concat is
    # implicit in the fused column layout).
    out = jnp.dot(pooled.astype(fcw_ref.dtype), fcw_ref[...],
                  preferred_element_type=jnp.float32)
    # TODO(synk): nn.Dropout(0.3) is treated as eval-mode identity (no stochastic mask).
    out_ref[...] = out + fcb_ref[...]


def pack_params(params, e_pad):
    """Pad / fuse natural-layout params into the lane-dense fused kernel layout."""
    convs = params["convs"]                 # [(w:(k,E,F), b:(F,)), ...]
    wfc, bfc = params["fc"]                 # (3F, C), (C,)
    E = convs[0][0].shape[1]
    F = convs[0][0].shape[-1]
    C = wfc.shape[-1]
    f_pad = _round_up(F, LANE)
    c_pad = _round_up(C, LANE)
    nf = len(KERNEL_SIZES) * f_pad
    k_max = max(KERNEL_SIZES)

    w_taps = jnp.zeros((k_max, e_pad, nf), jnp.float32)      # tap i, all kernel sizes
    b_fused = jnp.zeros((1, nf), jnp.float32)
    fc_fused = jnp.zeros((nf, c_pad), jnp.float32)
    for j, ((w, b), k) in enumerate(zip(convs, KERNEL_SIZES)):
        col0 = j * f_pad
        w_taps = w_taps.at[:k, :E, col0:col0 + F].set(w)
        b_fused = b_fused.at[0, col0:col0 + F].set(b)
        fc_fused = fc_fused.at[col0:col0 + F, :C].set(wfc[j * F:(j + 1) * F, :])
    bfc_fused = jnp.zeros((1, c_pad), jnp.float32).at[0, :C].set(bfc)
    return w_taps, b_fused, fc_fused, bfc_fused, F, f_pad, C, c_pad


def textcnn_forward(x, params, *, tile_b=None, matmul_dtype=jnp.float32,
                    vmem_budget_bytes=20 * 2**20):
    """Forward pass. matmul_dtype=bf16 is full-rate on v5e/v6e/v7x MXUs; bias,
    ReLU, max-pool and MXU accumulation always stay f32."""
    B, L, E = x.shape
    k_min, k_max = min(KERNEL_SIZES), max(KERNEL_SIZES)
    assert L >= k_max, "seq_len must be >= max kernel size"

    e_pad = _round_up(E, LANE)
    time_rows = _round_up(L - k_min + 1, SUBLANE)            # padded pool length
    l_pad = _round_up(time_rows + k_max - 1, SUBLANE)        # so every tap slice is in-bounds
    louts = tuple(L - k + 1 for k in KERNEL_SIZES)

    w_taps, b_fused, fc_fused, bfc_fused, F, f_pad, C, c_pad = pack_params(params, e_pad)
    nf = len(KERNEL_SIZES) * f_pad

    if matmul_dtype != jnp.float32:
        x = x.astype(matmul_dtype)
        w_taps = w_taps.astype(matmul_dtype)
        fc_fused = fc_fused.astype(matmul_dtype)
    in_bytes = jnp.dtype(matmul_dtype).itemsize

    # --- VMEM-budgeted tile_b ------------------------------------------------
    per_row = (2 * l_pad * e_pad * in_bytes          # x block (double-buffered)
               + 2 * time_rows * nf * 4              # conv accumulator + relu/mask temp (f32)
               + 2 * time_rows * e_pad * in_bytes    # shifted tap slices (~2 live)
               + nf * 4                              # pooled
               + 2 * c_pad * 4)                      # output block (double-buffered)
    fixed = 2 * (k_max * e_pad * nf * in_bytes + nf * 4
                 + nf * c_pad * in_bytes + c_pad * 4)  # weights/biases (double-buffered)

    if tile_b is None:
        tb = max(1, int((vmem_budget_bytes - fixed) // per_row))
        tb = max(SUBLANE, (tb // SUBLANE) * SUBLANE)         # sublane-aligned output block
        b8 = _round_up(B, SUBLANE)
        target_steps = 4 if b8 >= 32 else 2                  # >=2 steps: pipeline + both v7x TCs
        tb = min(tb, max(SUBLANE, _round_up(-(-b8 // target_steps), SUBLANE)))
        tile_b = tb
    else:
        tile_b = max(SUBLANE, _round_up(tile_b, SUBLANE))
    b_pad = max(_round_up(B, tile_b), 2 * tile_b)            # force grid >= 2
    grid_n = b_pad // tile_b

    vmem_need = fixed + tile_b * per_row
    vmem_limit = int(min(max(vmem_need * 1.3, 32 * 2**20), 56 * 2**20))

    # --- pad activations (zeros; exactness preserved by in-kernel masking) ----
    x_p = jnp.pad(x, ((0, b_pad - B), (0, l_pad - L), (0, e_pad - E)))

    flops = (2 * b_pad * time_rows * (k_max * e_pad) * nf    # 5 tap matmuls
             + 2 * b_pad * nf * c_pad)                       # fused FC matmul
    bytes_accessed = int(
        x_p.size * x_p.dtype.itemsize
        + w_taps.size * w_taps.dtype.itemsize
        + b_fused.size * 4
        + fc_fused.size * fc_fused.dtype.itemsize
        + bfc_fused.size * 4
        + b_pad * c_pad * 4)

    kernel = functools.partial(textcnn_kernel, time_rows=time_rows,
                               louts=louts, f_pad=f_pad)

    out = pl.pallas_call(
        kernel,
        out_shape=jax.ShapeDtypeStruct((b_pad, c_pad), jnp.float32),
        grid=(grid_n,),
        in_specs=[
            pl.BlockSpec((tile_b, l_pad, e_pad), lambda b: (b, 0, 0)),
            pl.BlockSpec((k_max, e_pad, nf), lambda b: (0, 0, 0)),
            pl.BlockSpec((1, nf), lambda b: (0, 0)),
            pl.BlockSpec((nf, c_pad), lambda b: (0, 0)),
            pl.BlockSpec((1, c_pad), lambda b: (0, 0)),
        ],
        out_specs=pl.BlockSpec((tile_b, c_pad), lambda b: (b, 0)),
        compiler_params=pltpu.CompilerParams(
            dimension_semantics=("parallel",),
            vmem_limit_bytes=vmem_limit),
        cost_estimate=pl.CostEstimate(flops=int(flops), transcendentals=0,
                                      bytes_accessed=bytes_accessed),
    )(x_p, w_taps, b_fused, fc_fused, bfc_fused)

    return out[:B, :C]


def init_params(key, embedding_dim, num_classes, num_filters=NUM_FILTERS):
    """Deterministic params. Conv weight stored as (k, E, F) == transpose of PyTorch's
    Conv2d weight (F, 1, k, E); fc weight stored as (3F, C) == W.T."""
    keys = jax.random.split(key, 2 * len(KERNEL_SIZES) + 2)
    convs = []
    for idx, k in enumerate(KERNEL_SIZES):
        fan_in = 1 * k * embedding_dim
        bound = float(1.0 / jnp.sqrt(fan_in))
        w = jax.random.uniform(keys[2 * idx], (k, embedding_dim, num_filters),
                               minval=-bound, maxval=bound, dtype=jnp.float32)
        b = jax.random.uniform(keys[2 * idx + 1], (num_filters,),
                               minval=-bound, maxval=bound, dtype=jnp.float32)
        convs.append((w, b))
    fan_in = len(KERNEL_SIZES) * num_filters
    bound = float(1.0 / jnp.sqrt(fan_in))
    wfc = jax.random.uniform(keys[-2], (fan_in, num_classes),
                             minval=-bound, maxval=bound, dtype=jnp.float32)
    bfc = jax.random.uniform(keys[-1], (num_classes,),
                             minval=-bound, maxval=bound, dtype=jnp.float32)
    return {"convs": convs, "fc": (wfc, bfc)}


def textcnn_reference(x, params):
    """Pure-JAX reference mirroring the PyTorch forward (dropout = identity)."""
    pooled = []
    for (w, b), k in zip(params["convs"], KERNEL_SIZES):
        lout = x.shape[1] - k + 1
        kE = w.shape[0] * w.shape[1]
        win = jnp.concatenate([x[:, i:i + lout, :] for i in range(k)], axis=-1)
        conv = jnp.einsum("blf,fn->bln", win, w.reshape(kE, -1)) + b
        pooled.append(jnp.max(jax.nn.relu(conv), axis=1))
    feat = jnp.concatenate(pooled, axis=1)
    wfc, bfc = params["fc"]
    return feat @ wfc + bfc


if __name__ == "__main__":
    key = jax.random.PRNGKey(0)
    kx, kp = jax.random.split(key)

    B, L, E, C = 2, 16, 32, 8  # batch, seq_len, embedding_dim, num_classes
    x = jax.random.normal(kx, (B, L, E), dtype=jnp.float32)
    params = init_params(kp, embedding_dim=E, num_classes=C)

    out = jax.block_until_ready(textcnn_forward(x, params))
    ref = textcnn_reference(x, params)
    assert out.shape == (B, C), out.shape
    assert jnp.allclose(out, ref, rtol=1e-3, atol=1e-3), (out, ref)

    # bf16 matmul-input path (full-rate on v5e/v6e/v7x MXUs); validated against
    # the f32 reference with a loose tolerance, accumulation stays f32.
    out_bf16 = jax.block_until_ready(
        textcnn_forward(x, params, matmul_dtype=jnp.bfloat16))
    assert out_bf16.shape == (B, C)
    assert jnp.allclose(out_bf16, ref, rtol=2e-2, atol=2e-2), (out_bf16, ref)

    print("KERNEL_OK")
</pallas_src>

<mosaic_0001>
module attributes {stable_mosaic.version = 11 : i64} {
  func.func @textcnn_kernel(%arg0: i32, %arg1: memref<8x24x128xf32, #tpu.memory_space<vmem>>, %arg2: memref<5x128x384xf32, #tpu.memory_space<vmem>>, %arg3: memref<1x384xf32, #tpu.memory_space<vmem>>, %arg4: memref<384x128xf32, #tpu.memory_space<vmem>>, %arg5: memref<1x128xf32, #tpu.memory_space<vmem>>, %arg6: memref<8x128xf32, #tpu.memory_space<vmem>>) attributes {dimension_semantics = [#tpu.dimension_semantics<parallel>], iteration_bounds = array<i64: 2>, scalar_prefetch = 0 : i64, scratch_operands = 0 : i64, tpu.core_type = #tpu.core_type<tc>, window_params = [{transform_indices = @transform_0, window_bounds = array<i64: 8, 24, 128>}, {pipeline_mode = #tpu.pipeline_mode<synchronous>, transform_indices = @transform_1, window_bounds = array<i64: 5, 128, 384>}, {pipeline_mode = #tpu.pipeline_mode<synchronous>, transform_indices = @transform_2, window_bounds = array<i64: 1, 384>}, {pipeline_mode = #tpu.pipeline_mode<synchronous>, transform_indices = @transform_3, window_bounds = array<i64: 384, 128>}, {pipeline_mode = #tpu.pipeline_mode<synchronous>, transform_indices = @transform_4, window_bounds = array<i64: 1, 128>}, {transform_indices = @transform_5, window_bounds = array<i64: 8, 128>}]} {
    %c0 = arith.constant 0 : index
    %c0_0 = arith.constant 0 : index
    %c0_1 = arith.constant 0 : index
    %0 = vector.load %arg1[%c0, %c0_0, %c0_1] : memref<8x24x128xf32, #tpu.memory_space<vmem>>, vector<8x16x128xf32>
    %1 = vector.shape_cast %0 : vector<8x16x128xf32> to vector<128x128xf32>
    %c0_2 = arith.constant 0 : index
    %c0_3 = arith.constant 0 : index
    %c0_4 = arith.constant 0 : index
    %2 = vector.load %arg2[%c0_2, %c0_3, %c0_4] : memref<5x128x384xf32, #tpu.memory_space<vmem>>, vector<1x128x384xf32>
    %3 = vector.shape_cast %2 : vector<1x128x384xf32> to vector<128x384xf32>
    %cst = arith.constant dense<0.000000e+00> : vector<128x384xf32>
    %4 = tpu.matmul %1, %3, %cst {dimension_numbers = #tpu.dot_dimension_numbers<[1], [0], [0], [1], [0, 0, 1, 1], [], []>} : vector<128x128xf32>, vector<128x384xf32>, vector<128x384xf32> -> vector<128x384xf32>
    %c0_5 = arith.constant 0 : index
    %c1 = arith.constant 1 : index
    %c0_6 = arith.constant 0 : index
    %5 = vector.load %arg1[%c0_5, %c1, %c0_6] : memref<8x24x128xf32, #tpu.memory_space<vmem>>, vector<8x16x128xf32>
    %6 = vector.shape_cast %5 : vector<8x16x128xf32> to vector<128x128xf32>
    %c1_7 = arith.constant 1 : index
    %c0_8 = arith.constant 0 : index
    %c0_9 = arith.constant 0 : index
    %7 = vector.load %arg2[%c1_7, %c0_8, %c0_9] : memref<5x128x384xf32, #tpu.memory_space<vmem>>, vector<1x128x384xf32>
    %8 = vector.shape_cast %7 : vector<1x128x384xf32> to vector<128x384xf32>
    %cst_10 = arith.constant dense<0.000000e+00> : vector<128x384xf32>
    %9 = tpu.matmul %6, %8, %cst_10 {dimension_numbers = #tpu.dot_dimension_numbers<[1], [0], [0], [1], [0, 0, 1, 1], [], []>} : vector<128x128xf32>, vector<128x384xf32>, vector<128x384xf32> -> vector<128x384xf32>
    %10 = arith.addf %4, %9 : vector<128x384xf32>
    %c0_11 = arith.constant 0 : index
    %c2 = arith.constant 2 : index
    %c0_12 = arith.constant 0 : index
    %11 = vector.load %arg1[%c0_11, %c2, %c0_12] : memref<8x24x128xf32, #tpu.memory_space<vmem>>, vector<8x16x128xf32>
    %12 = vector.shape_cast %11 : vector<8x16x128xf32> to vector<128x128xf32>
    %c2_13 = arith.constant 2 : index
    %c0_14 = arith.constant 0 : index
    %c0_15 = arith.constant 0 : index
    %13 = vector.load %arg2[%c2_13, %c0_14, %c0_15] : memref<5x128x384xf32, #tpu.memory_space<vmem>>, vector<1x128x384xf32>
    %14 = vector.shape_cast %13 : vector<1x128x384xf32> to vector<128x384xf32>
    %cst_16 = arith.constant dense<0.000000e+00> : vector<128x384xf32>
    %15 = tpu.matmul %12, %14, %cst_16 {dimension_numbers = #tpu.dot_dimension_numbers<[1], [0], [0], [1], [0, 0, 1, 1], [], []>} : vector<128x128xf32>, vector<128x384xf32>, vector<128x384xf32> -> vector<128x384xf32>
    %16 = arith.addf %10, %15 : vector<128x384xf32>
    %c0_17 = arith.constant 0 : index
    %c3 = arith.constant 3 : index
    %c0_18 = arith.constant 0 : index
    %17 = vector.load %arg1[%c0_17, %c3, %c0_18] : memref<8x24x128xf32, #tpu.memory_space<vmem>>, vector<8x16x128xf32>
    %18 = vector.shape_cast %17 : vector<8x16x128xf32> to vector<128x128xf32>
    %c3_19 = arith.constant 3 : index
    %c0_20 = arith.constant 0 : index
    %c0_21 = arith.constant 0 : index
    %19 = vector.load %arg2[%c3_19, %c0_20, %c0_21] : memref<5x128x384xf32, #tpu.memory_space<vmem>>, vector<1x128x384xf32>
    %20 = vector.shape_cast %19 : vector<1x128x384xf32> to vector<128x384xf32>
    %cst_22 = arith.constant dense<0.000000e+00> : vector<128x384xf32>
    %21 = tpu.matmul %18, %20, %cst_22 {dimension_numbers = #tpu.dot_dimension_numbers<[1], [0], [0], [1], [0, 0, 1, 1], [], []>} : vector<128x128xf32>, vector<128x384xf32>, vector<128x384xf32> -> vector<128x384xf32>
    %22 = arith.addf %16, %21 : vector<128x384xf32>
    %c0_23 = arith.constant 0 : index
    %c4 = arith.constant 4 : index
    %c0_24 = arith.constant 0 : index
    %23 = vector.load %arg1[%c0_23, %c4, %c0_24] : memref<8x24x128xf32, #tpu.memory_space<vmem>>, vector<8x16x128xf32>
    %24 = vector.shape_cast %23 : vector<8x16x128xf32> to vector<128x128xf32>
    %c4_25 = arith.constant 4 : index
    %c0_26 = arith.constant 0 : index
    %c0_27 = arith.constant 0 : index
    %25 = vector.load %arg2[%c4_25, %c0_26, %c0_27] : memref<5x128x384xf32, #tpu.memory_space<vmem>>, vector<1x128x384xf32>
    %26 = vector.shape_cast %25 : vector<1x128x384xf32> to vector<128x384xf32>
    %cst_28 = arith.constant dense<0.000000e+00> : vector<128x384xf32>
    %27 = tpu.matmul %24, %26, %cst_28 {dimension_numbers = #tpu.dot_dimension_numbers<[1], [0], [0], [1], [0, 0, 1, 1], [], []>} : vector<128x128xf32>, vector<128x384xf32>, vector<128x384xf32> -> vector<128x384xf32>
    %28 = arith.addf %22, %27 : vector<128x384xf32>
    %c0_29 = arith.constant 0 : index
    %c0_30 = arith.constant 0 : index
    %29 = vector.load %arg3[%c0_29, %c0_30] : memref<1x384xf32, #tpu.memory_space<vmem>>, vector<1x384xf32>
    %30 = vector.broadcast %29 : vector<1x384xf32> to vector<128x384xf32>
    %31 = arith.addf %28, %30 : vector<128x384xf32>
    %cst_31 = arith.constant 0.000000e+00 : f32
    %32 = vector.broadcast %cst_31 : f32 to vector<128x384xf32>
    %33 = arith.maximumf %31, %32 : vector<128x384xf32>
    %34 = vector.shape_cast %33 : vector<128x384xf32> to vector<8x16x384xf32>
    %35 = tpu.iota {dimensions = array<i32: 0>} : vector<16x384xi32>
    %36 = tpu.iota {dimensions = array<i32: 1>} : vector<16x384xi32>
    %c12_i32 = arith.constant 12 : i32
    %37 = vector.broadcast %c12_i32 : i32 to vector<16x384xi32>
    %c0_i32 = arith.constant 0 : i32
    %38 = vector.broadcast %c0_i32 : i32 to vector<16x384xi32>
    %39 = arith.cmpi sge, %36, %38 : vector<16x384xi32>
    %c128_i32 = arith.constant 128 : i32
    %40 = vector.broadcast %c128_i32 : i32 to vector<16x384xi32>
    %41 = arith.cmpi slt, %36, %40 : vector<16x384xi32>
    %42 = arith.andi %39, %41 : vector<16x384xi1>
    %c14_i32 = arith.constant 14 : i32
    %43 = vector.broadcast %c14_i32 : i32 to vector<16x384xi32>
    %44 = arith.select %42, %43, %37 : vector<16x384xi1>, vector<16x384xi32>
    %c128_i32_32 = arith.constant 128 : i32
    %45 = vector.broadcast %c128_i32_32 : i32 to vector<16x384xi32>
    %46 = arith.cmpi sge, %36, %45 : vector<16x384xi32>
    %c256_i32 = arith.constant 256 : i32
    %47 = vector.broadcast %c256_i32 : i32 to vector<16x384xi32>
    %48 = arith.cmpi slt, %36, %47 : vector<16x384xi32>
    %49 = arith.andi %46, %48 : vector<16x384xi1>
    %c13_i32 = arith.constant 13 : i32
    %50 = vector.broadcast %c13_i32 : i32 to vector<16x384xi32>
    %51 = arith.select %49, %50, %44 : vector<16x384xi1>, vector<16x384xi32>
    %52 = arith.cmpi slt, %35, %51 : vector<16x384xi32>
    %53 = vector.shape_cast %52 : vector<16x384xi1> to vector<1x16x384xi1>
    %cst_33 = arith.constant 0.000000e+00 : f32
    %54 = vector.shape_cast %53 : vector<1x16x384xi1> to vector<1x16x384xi1>
    %55 = vector.broadcast %54 : vector<1x16x384xi1> to vector<8x16x384xi1>
    %56 = vector.broadcast %cst_33 : f32 to vector<8x16x384xf32>
    %57 = arith.select %55, %34, %56 : vector<8x16x384xi1>, vector<8x16x384xf32>
    %cst_34 = arith.constant dense<0xFF800000> : vector<8x384xf32>
    %58 = vector.multi_reduction <maximumf>, %57, %cst_34 [1] : vector<8x16x384xf32> to vector<8x384xf32>
    %c0_35 = arith.constant 0 : index
    %c0_36 = arith.constant 0 : index
    %59 = vector.load %arg4[%c0_35, %c0_36] : memref<384x128xf32, #tpu.memory_space<vmem>>, vector<384x128xf32>
    %cst_37 = arith.constant dense<0.000000e+00> : vector<8x128xf32>
    %60 = tpu.matmul %58, %59, %cst_37 {dimension_numbers = #tpu.dot_dimension_numbers<[1], [0], [0], [1], [0, 0, 1, 1], [], []>} : vector<8x384xf32>, vector<384x128xf32>, vector<8x128xf32> -> vector<8x128xf32>
    %c0_38 = arith.constant 0 : index
    %c0_39 = arith.constant 0 : index
    %61 = vector.load %arg5[%c0_38, %c0_39] : memref<1x128xf32, #tpu.memory_space<vmem>>, vector<1x128xf32>
    %62 = vector.broadcast %61 : vector<1x128xf32> to vector<8x128xf32>
    %63 = arith.addf %60, %62 : vector<8x128xf32>
    %c0_40 = arith.constant 0 : index
    %c0_41 = arith.constant 0 : index
    %64 = vector.load %arg6[%c0_40, %c0_41] : memref<8x128xf32, #tpu.memory_space<vmem>>, vector<8x128xf32>
    tpu.vector_store %arg6[%c0_40, %c0_41], %63 {strides = array<i32>} : memref<8x128xf32, #tpu.memory_space<vmem>>, vector<8x128xf32>,
    return
  }
  func.func @transform_0(%arg0: i32) -> (i32, i32, i32) {
    %c0_i32 = arith.constant 0 : i32
    %c0_i32_0 = arith.constant 0 : i32
    %c0_i32_1 = arith.constant 0 : i32
    return %arg0, %c0_i32, %c0_i32_0 : i32, i32, i32
  }
  func.func @transform_1(%arg0: i32) -> (i32, i32, i32) {
    %c0_i32 = arith.constant 0 : i32
    %c0_i32_0 = arith.constant 0 : i32
    %c0_i32_1 = arith.constant 0 : i32
    %c0_i32_2 = arith.constant 0 : i32
    return %c0_i32, %c0_i32_0, %c0_i32_1 : i32, i32, i32
  }
  func.func @transform_2(%arg0: i32) -> (i32, i32) {
    %c0_i32 = arith.constant 0 : i32
    %c0_i32_0 = arith.constant 0 : i32
    %c0_i32_1 = arith.constant 0 : i32
    return %c0_i32, %c0_i32_0 : i32, i32
  }
  func.func @transform_3(%arg0: i32) -> (i32, i32) {
    %c0_i32 = arith.constant 0 : i32
    %c0_i32_0 = arith.constant 0 : i32
    %c0_i32_1 = arith.constant 0 : i32
    return %c0_i32, %c0_i32_0 : i32, i32
  }
  func.func @transform_4(%arg0: i32) -> (i32, i32) {
    %c0_i32 = arith.constant 0 : i32
    %c0_i32_0 = arith.constant 0 : i32
    %c0_i32_1 = arith.constant 0 : i32
    return %c0_i32, %c0_i32_0 : i32, i32
  }
  func.func @transform_5(%arg0: i32) -> (i32, i32) {
    %c0_i32 = arith.constant 0 : i32
    %c0_i32_0 = arith.constant 0 : i32
    return %arg0, %c0_i32 : i32, i32
  }
}

</mosaic_0001>

<bundles_post_ra>
// kernel: tpu_custom_call.1
= control target key start
LH: loop header
LB: loop body
LE: loop exit
PB: predicated region body
PF: predicated region fallthrough
CT: control target
= control target key end

     0   :  { %10 = vsyncpa [#allocation3], 0  ;;  %s5336_s0 = inlined_call_operand.hbm [shape: f32[16,24,128], index: 0, kind: input, shape index: {}]   ;;  %s5337_s1 = inlined_call_operand.hbm [shape: f32[5,128,384], index: 1, kind: input, shape index: {}]   ;;  %s5338_s2 = inlined_call_operand.vmem [shape: f32[1,384], index: 2, kind: input, shape index: {}]   ;;  %s5339_s3 = inlined_call_operand.hbm [shape: f32[384,128], index: 3, kind: input, shape index: {}]   ;;  %s5340_s4 = inlined_call_operand.vmem [shape: f32[1,128], index: 4, kind: input, shape index: {}]   ;;  %s5341_s5 = inlined_call_operand.hbm [shape: f32[16,128], index: 5, kind: output, shape index: {}]  }
   0x1   :  { %12 = vsyncpa [#allocation3 + $0x1], 0 }
   0x2   :  { %13 = vsyncpa [#allocation6], 0 }
   0x3   :  { %14 = vsyncpa [#allocation4], 0 }
   0x4   :  { %16 = vsyncpa [#allocation4 + $0x1], 0  ;;  %s4392_s18 = smov 0   ;;  %s4394_s19 = smov 0  }
   0x5   :  { %s4396_s20 = smov 0   ;;  %s4398_s21 = smov 0  }
   0x6 LB: > { %s4413_s22 = sadd.s32 4294967295, %s4349_s21   ;;  %s3004_s23 = sadd.s32 4294967294, %s4349_s21   ;;  %s4349_s21 = sphi %s4398_s21, %s5368_s21   ;;  %s4345_s20 = sphi %s4396_s20, %s5367_s20   ;;  %s4341_s19 = sphi %s4394_s19, %s5366_s19   ;;  %s4337_s18 = sphi %s4392_s18, %s5365_s18  }
   0x7   : > { %p42_p0 = scmp.ne.s32.totalorder %s4341_s19, %s4337_s18  ;;  %p5342_p1 = scmp.eq.s32.totalorder %s4413_s22, 0 }
   0x8   : > { %p156_p3 = scmp.eq.s32.totalorder %s3004_s23, 1  ;;  %p3005_p5 = scmp.ge.s32.totalorder %s4349_s21, 1 }
   0x9   : > { %p4422_p4 = por %p5342_p1, %p42_p0  ;;  %p163_p7 = scmp.lt.s32.totalorder %s4349_s21, 3 }
   0xa   : > { %p4427_p6 = por %p156_p3, %p42_p0  ;;  %s4351_s27 = smov [#allocation5]  }
   0xb   : > { %s5349_s24 = scalar_select %p4422_p4, 1, 0 }
   0xc   : > { %s5350_s25 = scalar_select %p4427_p6, 1, 0 }
   0xd   : > { %p4432_p8 = pnand %p3005_p5, %p163_p7  ;;  %s175_s28 = sshll.u32 %s4351_s27, 4  ;;  %s4436_s28 = int_to_ptr.vmem [resolvable:$true] %s175_s28 }
   0xe   : > { %s4352_s30 = smov [#allocation7]   ;;  %s4193_s9 = scalar_lea.hbm %s5337_s1, 30720 }
   0xf   : > { %p4131_p9 = pneg %p4432_p8  ;;  %s191_s6 = sshll.u32 %s4352_s30, 4  ;;  %s4447_s6 = int_to_ptr.vmem [resolvable:$true] %s191_s6 }
  0x10   : > { %p4194_p12 = scmp.ne.s32.totalorder %s5337_s1, %s4193_s9  ;;  %p4200_p5 = scmp.lt.u32.totalorder %s4193_s9, %s5337_s1 }
  0x11   : > { %p4443_p11 = pnand %p4131_p9, %p5342_p1 }
  0x13   : > { %p4195_p13 = pneg %p4443_p11 }
  0x15   : > { %p4196_p0 = pnand %p4195_p13, %p4194_p12 }
  0x17   : > { %p4197_p3 = pneg %p4196_p0 }
  0x19   : > { %p4202_p7 = pnand %p4200_p5, %p4197_p3 }
  0x1b   : > { %4205 = shalt.err (!%p4202_p7)
}
  0x1c   : > { %s4206_s14 = scalar_lea.vmem %s4436_s28, 30720  ;;  %p4214_p2 = scmp.lt.s32.totalorder %s4436_s28, %s4436_s28 }
  0x1d   : > { %p4207_p9 = scmp.ne.s32.totalorder %s4436_s28, %s4206_s14  ;;  %p4215_p12 = scmp.lt.s32.totalorder %s4206_s14, %s4206_s14 }
  0x1f   : > { %p4209_p10 = pnand %p4207_p9, %p4195_p13  ;;  %p4216_p0 = por %p4215_p12, %p4214_p2 }
  0x21   : > { %p4210_p1 = pneg %p4209_p10 }
  0x23   : > { %p4217_p6 = pnand %p4216_p0, %p4210_p1 }
  0x25   : > { %4220 = shalt.err (!%p4217_p6)
}
  0x26   : > { %s4353_s15 = smov 384   ;;  %s4354_s16 = smov 24  }
  0x27   : > { %4134 = dma.hbm_to_vmem [thread:$0]  (!%p4443_p11), %s5337_s1, 30720, %s4436_s28, [#allocation6], %s4353_s15, %s4353_s15, %s4354_s16  }
  0x28   : > { %s4221_s7 = scalar_lea.hbm %s5339_s3, 6144 }
  0x29   : > { %p4222_p2 = scmp.ne.s32.totalorder %s5339_s3, %s4221_s7  ;;  %p4228_p10 = scmp.lt.u32.totalorder %s4221_s7, %s5339_s3 }
  0x2b   : > { %p4224_p1 = pnand %p4222_p2, %p4195_p13 }
  0x2d   : > { %p4225_p6 = pneg %p4224_p1 }
  0x2f   : > { %p4230_p3 = pnand %p4228_p10, %p4225_p6 }
  0x31   : > { %4233 = shalt.err (!%p4230_p3)
}
  0x32   : > { %s4234_s28 = scalar_lea.vmem %s4447_s6, 6144  ;;  %p4242_p12 = scmp.lt.s32.totalorder %s4447_s6, %s4447_s6 }
  0x33   : > { %p4235_p5 = scmp.ne.s32.totalorder %s4447_s6, %s4234_s28  ;;  %p4243_p0 = scmp.lt.s32.totalorder %s4234_s28, %s4234_s28 }
  0x35   : > { %p4237_p7 = pnand %p4235_p5, %p4195_p13  ;;  %p4244_p2 = por %p4243_p0, %p4242_p12 }
  0x37   : > { %p4238_p9 = pneg %p4237_p7 }
  0x39   : > { %p4245_p1 = pnand %p4244_p2, %p4238_p9 }
  0x3b   : > { %4248 = shalt.err (!%p4245_p1)
}
  0x3c   : > { %s5343_s12 = smov 128   ;;  %s4356_s13 = smov 8  }
  0x3d   : > { %4137 = dma.hbm_to_vmem [thread:$0]  (!%p4443_p11), %s5339_s3, 6144, %s4447_s6, [#allocation6], %s5343_s12, %s5343_s12, %s4356_s13  }
  0x3e   : > { %s4505_s16 = sadd.s32 1, %s4349_s21   ;;  %s29_s23 = sadd.s32 1, %s4345_s20 }
  0x3f   : > { %s26_s17 = ssub.s32 %s4349_s21, %s4505_s16  ;;  %p36_p6 = scmp.ne.s32.totalorder %s4345_s20, %s4341_s19 }
  0x40   : > { %p27_p13 = scmp.eq.s32.totalorder %s26_s17, 0  ;;  %p37_p10 = scmp.eq.s32.totalorder %s4349_s21, 0 }
  0x41   : > { %p5353_p5 = scmp.eq.s32.totalorder %s4413_s22, 1  ;;  %p4148_p9 = scmp.lt.s32.totalorder %s4349_s21, 2 }
  0x42   : > { %s4514_s27 = scalar_select %p27_p13, %s4345_s20, %s29_s23  }
  0x43   : > { %p38_p3 = por %p37_p10, %p36_p6  ;;  %p4518_p7 = por %p5353_p5, %p36_p6 }
  0x44   : > { %s208_s30 = sand.u32 1, %s4345_s20   ;;  %s4117_s6 = smul.u32 3072, %s4349_s21 }
  0x45   : > { %s5354_s29 = scalar_select %p4518_p7, 1, 0 }
  0x46   : > { %s4116_s7 = smul.u32 192, %s208_s30  ;;  %p4525_p11 = pnand %p4148_p9, %p38_p3 }
  0x47   : > { %s4532_s11 = scalar_lea.hbm %s5336_s0, %s4117_s6  ;;  %s4536_s15 = scalar_lea.sflag [#allocation3], %s208_s30 }
  0x48   : > { %s212_s28 = scalar_lea.vmem [#allocation2], %s4116_s7  ;;  %s4249_s17 = scalar_lea.hbm %s4532_s11, 3072 }
  0x49   : > { %s220_s14 = sshll.u32 %s212_s28, 4  ;;  %p4250_p12 = scmp.ne.s32.totalorder %s4532_s11, %s4249_s17  ;;  %s4534_s14 = int_to_ptr.vmem [resolvable:$true] %s220_s14 }
  0x4a   : > { %p4251_p0 = pneg %p4525_p11  ;;  %s4254_s9 = scalar_lea.hbm %s5336_s0, 6144 }
  0x4b   : > { %p4255_p13 = scmp.lt.u32.totalorder %s4532_s11, %s5336_s0  ;;  %p4256_p6 = scmp.lt.u32.totalorder %s4254_s9, %s4249_s17 }
  0x4c   : > { %p4252_p2 = pnand %p4251_p0, %p4250_p12  ;;  %p4258_p3 = scmp.lt.u32.totalorder %s4249_s17, %s4532_s11 }
  0x4d   : > { %p4257_p10 = por %p4256_p6, %p4255_p13 }
  0x4e   : > { %p4253_p1 = pneg %p4252_p2 }
  0x4f   : > { %p4259_p5 = por %p4258_p3, %p4257_p10 }
  0x51   : > { %p4260_p9 = pnand %p4259_p5, %p4253_p1 }
  0x53   : > { %4263 = shalt.err (!%p4260_p9)
}
  0x54   : > { %s4264_s30 = scalar_lea.vmem %s4534_s14, 3072  ;;  %s4357_s7 = smov [#allocation2]  }
  0x55   : > { %p4265_p12 = scmp.ne.s32.totalorder %s4534_s14, %s4264_s30  ;;  %s4269_s28 = sshll.u32 %s4357_s7, 4  ;;  %s4270_s28 = int_to_ptr.vmem [resolvable:$false] %s4269_s28 }
  0x56   : > { %s4271_s12 = scalar_lea.vmem %s4270_s28, 6144  ;;  %p4272_p4 = scmp.lt.s32.totalorder %s4534_s14, %s4270_s28 }
  0x57   : > { %p4267_p2 = pnand %p4265_p12, %p4251_p0  ;;  %p4273_p13 = scmp.lt.s32.totalorder %s4271_s12, %s4264_s30 }
  0x59   : > { %p4268_p7 = pneg %p4267_p2  ;;  %p4274_p6 = por %p4273_p13, %p4272_p4 }
  0x5b   : > { %p4275_p10 = pnand %p4274_p6, %p4268_p7 }
  0x5d   : > { %4278 = shalt.err (!%p4275_p10)
}
  0x5e   : > { %s5356_s17 = smov 128   ;;  %232 = sbr.rel (%p4432_p8) target bundleno = 902 (0x386), region = 40 }
  0x5f   : > { %4141 = dma.hbm_to_vmem [thread:$0]  (!%p4525_p11), %s4532_s11, 3072, %s4534_s14, %s4536_s15, %s5356_s17, %s5356_s17, %s4356_s13  }
  0x60   : > { %s4570_s23 = sand.u32 (!%p4432_p8), 1, %s4341_s19   ;;  %p5357_p4 = scmp.ne.s32.totalorder (!%p4432_p8), %s5349_s24, 0 }
  0x61   : > { %s4118_s6 = smul.u32 (!%p4432_p8), 192, %s4570_s23  ;;  %s235_s9 = scalar_lea.sflag (!%p4432_p8), [#allocation3], %s4570_s23 }
  0x63   : > { %s4574_s10 = scalar_lea.vmem (!%p4432_p8), [#allocation2], %s4118_s6 }
  0x65   : > { %4324 = dma.done.wait (%p5357_p4), %s235_s9, 3072  }
  0x66   : > { %4326 = vsyncadd (%p5357_p4), %s235_s9, 4294964224  ;;  %p5358_p7 = scmp.eq.s32.totalorder %s4413_s22, 0 }
  0x68   : > { %4328 = dma.done.wait (%p5358_p7), [#allocation6], 36864   ;;  %p5359_p8 = pmov %p5358_p7 }
  0x69   : > { %v5348_v0 = vmov 0.0   ;;  %v356_v1 = vld [vmem:[#allocation5 + $0x188] sm:$0xff]  ;;  %v359_v2 = vld [vmem:[#allocation5 + $0x1a0] sm:$0xff]  ;;  %v358_v7 = vld [vmem:[#allocation5 + $0x198] sm:$0xff]  ;;  %vm2729_vm3 = vcmask 1041409   ;;  %vm2731_vm4 = vcmask 1042434  }
  0x6a   : > { %4330 = vsyncadd (%p5359_p8), [#allocation6], 4294930432  ;;  %467 = vmatprep.mubr.f32.mxu1 %v5348_v0  ;;  %773 = vmatprep.mubr.f32.mxu0 %v5348_v0  ;;  %v291_v3 = vld [vmem:[#allocation5 + $0x8] sm:$0xff]  ;;  %v3548_v4 = vpack.c.bf16 %v359_v2, %v356_v1  ;;  %v294_v5 = vld [vmem:[#allocation5 + $0x20] sm:$0xff]  ;;  %vm2733_vm5 = vcmask 1043459   ;;  %vm2735_vm6 = vcmask 1044484  }
  0x6b   : > { %v355_v6 = vld [vmem:[#allocation5 + $0x180] sm:$0xff]  ;;  %v3612_v8 = vpack.c.bf16 %v294_v5, %v291_v3  ;;  %v293_v11 = vld [vmem:[#allocation5 + $0x18] sm:$0xff]  ;;  %v365_v14 = vld [vmem:[#allocation5 + $0x1d0] sm:$0xff]  ;;  %vm2737_vm7 = vcmask 1045509   ;;  %vm2739_vm8 = vcmask 1046534   ;;  %vm2741_vm9 = vcmask 1047559  }
  0x6c   : > { %v3550_v9 = vpack.c.bf16 %v358_v7, %v355_v6  ;;  %v290_v10 = vld [vmem:[#allocation5] sm:$0xff]  ;;  %v362_v12 = vld [vmem:[#allocation5 + $0x1b8] sm:$0xff]  ;;  %3549 = vmatprep.subr.bf16.mxu1 %v3548_v4  ;;  %v300_v16 = vld [vmem:[#allocation5 + $0x50] sm:$0xff]  ;;  %vm4360_vm10 = vmmov 0   ;;  %s3015_s13 = sshll.u32 %s4570_s23, 3  ;;  %s3018_s14 = sshll.u32 %s4413_s22, 7 }
  0x6d   : > { %v3614_v13 = vpack.c.bf16 %v293_v11, %v290_v10  ;;  %v297_v15 = vld [vmem:[#allocation5 + $0x38] sm:$0xff]  ;;  %3613 = vmatprep.subr.bf16.mxu0 %v3612_v8  ;;  %v3552_v17 = vpack.c.bf16 %v365_v14, %v362_v12  ;;  %v361_v19 = vld [vmem:[#allocation5 + $0x1b0] sm:$0xff]  ;;  %v364_v20 = vld [vmem:[#allocation5 + $0x1c8] sm:$0xff]  ;;  %s272_s15 = scalar_lea.vmem [#allocation8], %s3015_s13  ;;  %s5292_s12 = scalar_lea.hbm %s5341_s5, %s3018_s14 }
  0x6e   : > { %3551 = vmatpush1.bf16.msra.mxu1 %v3550_v9  ;;  %v3616_v18 = vpack.c.bf16 %v300_v16, %v297_v15  ;;  %v296_v21 = vld [vmem:[#allocation5 + $0x30] sm:$0xff]  ;;  %v3554_v22 = vpack.c.bf16 %v364_v20, %v361_v19  ;;  %v299_v23 = vld [vmem:[#allocation5 + $0x48] sm:$0xff]  ;;  %v371_v25 = vld [vmem:[#allocation5 + $0x200] sm:$0xff]  ;;  %s2915_s30 = sshll.u32 %s272_s15, 4  ;;  %s2902_s17 = scalar_lea.sflag [#allocation4], %s4570_s23  ;;  %s5294_s30 = int_to_ptr.vmem [resolvable:$true] %s2915_s30 }
  0x6f   : > { %3615 = vmatpush1.bf16.msra.mxu0 %v3614_v13  ;;  %v368_v24 = vld [vmem:[#allocation5 + $0x1e8] sm:$0xff]  ;;  %3553 = vmatprep.subr.bf16.mxu1 %v3552_v17  ;;  %v3618_v26 = vpack.c.bf16 %v299_v23, %v296_v21  ;;  %v306_v29 = vld [vmem:[#allocation5 + $0x80] sm:$0xff]  ;;  %v370_v32 = vld [vmem:[#allocation5 + $0x1f8] sm:$0xff]  ;;  %s4279_s6 = scalar_lea.vmem %s5294_s30, 128  ;;  %p5362_p0 = scmp.ne.s32.totalorder %s5354_s29, 0 }
  0x70   : > { %3617 = vmatprep.subr.bf16.mxu0 %v3616_v18  ;;  %v3556_v27 = vpack.c.bf16 %v371_v25, %v368_v24  ;;  %v303_v28 = vld [vmem:[#allocation5 + $0x68] sm:$0xff]  ;;  %v367_v30 = vld [vmem:[#allocation5 + $0x1e0] sm:$0xff]  ;;  %v305_v34 = vld [vmem:[#allocation5 + $0x78] sm:$0xff]  ;;  %p4280_p11 = scmp.ne.s32.totalorder %s5294_s30, %s4279_s6  ;;  %s4361_s22 = smov [#allocation8]  }
  0x71   : > { %v3620_v31 = vpack.c.bf16 %v306_v29, %v303_v28  ;;  %v302_v33 = vld [vmem:[#allocation5 + $0x60] sm:$0xff]  ;;  %v3558_v35 = vpack.c.bf16 %v370_v32, %v367_v30  ;;  %v374_v36 = vld [vmem:[#allocation5 + $0x218] sm:$0xff]  ;;  %v377_v37 = vld [vmem:[#allocation5 + $0x230] sm:$0xff]  ;;  %s4283_s9 = sshll.u32 %s4361_s22, 4  ;;  %s4284_s9 = int_to_ptr.vmem [resolvable:$false] %s4283_s9 }
  0x72   : > { %3555 = vmatpush1.bf16.msra.mxu1 %v3554_v22  ;;  %v309_v38 = vld [vmem:[#allocation5 + $0x98] sm:$0xff]  ;;  %v3622_v39 = vpack.c.bf16 %v305_v34, %v302_v33  ;;  %v3560_v40 = vpack.c.bf16 %v377_v37, %v374_v36  ;;  %v312_v41 = vld [vmem:[#allocation5 + $0xb0] sm:$0xff]  ;;  %v376_v43 = vld [vmem:[#allocation5 + $0x228] sm:$0xff]  ;;  %p4281_p1 = pnand %p4280_p11, %p5362_p0  ;;  %p4286_p5 = scmp.lt.s32.totalorder %s5294_s30, %s4284_s9 }
  0x73   : > { %3619 = vmatpush1.bf16.msra.mxu0 %v3618_v26  ;;  %3557 = vmatprep.subr.bf16.mxu1 %v3556_v27  ;;  %v373_v42 = vld [vmem:[#allocation5 + $0x210] sm:$0xff]  ;;  %v3624_v44 = vpack.c.bf16 %v312_v41, %v309_v38  ;;  %v311_v46 = vld [vmem:[#allocation5 + $0xa8] sm:$0xff]  ;;  %v383_v48 = vld [vmem:[#allocation5 + $0x260] sm:$0xff] }
  0x74   : > { %3621 = vmatprep.subr.bf16.mxu0 %v3620_v31  ;;  %v308_v45 = vld [vmem:[#allocation5 + $0x90] sm:$0xff]  ;;  %v380_v47 = vld [vmem:[#allocation5 + $0x248] sm:$0xff]  ;;  %v318_v50 = vld [vmem:[#allocation5 + $0xe0] sm:$0xff]  ;;  %v3562_v51 = vpack.c.bf16 %v376_v43, %v373_v42  ;;  %p4282_p3 = pneg %p4281_p1 }
  0x75   : > { %v315_v49 = vld [vmem:[#allocation5 + $0xc8] sm:$0xff]  ;;  %v3626_v52 = vpack.c.bf16 %v311_v46, %v308_v45  ;;  %v3564_v53 = vpack.c.bf16 %v383_v48, %v380_v47  ;;  %v379_v54 = vld [vmem:[#allocation5 + $0x240] sm:$0xff]  ;;  %v382_v55 = vld [vmem:[#allocation5 + $0x258] sm:$0xff] }
  0x76   : > { %3559 = vmatpush1.bf16.msra.mxu1 %v3558_v35  ;;  %v314_v56 = vld [vmem:[#allocation5 + $0xc0] sm:$0xff]  ;;  %v3628_v57 = vpack.c.bf16 %v318_v50, %v315_v49  ;;  %v317_v58 = vld [vmem:[#allocation5 + $0xd8] sm:$0xff]  ;;  %v389_v60 = vld [vmem:[#allocation5 + $0x290] sm:$0xff]  ;;  %v3566_v63 = vpack.c.bf16 %v382_v55, %v379_v54 }
  0x77   : > { %3623 = vmatpush1.bf16.msra.mxu0 %v3622_v39  ;;  %3561 = vmatprep.subr.bf16.mxu1 %v3560_v40  ;;  %v386_v59 = vld [vmem:[#allocation5 + $0x278] sm:$0xff]  ;;  %v324_v62 = vld [vmem:[#allocation5 + $0x110] sm:$0xff]  ;;  %v3630_v1 = vpack.c.bf16 %v317_v58, %v314_v56  ;;  %v388_v4 = vld [vmem:[#allocation5 + $0x288] sm:$0xff] }
  0x78   : > { %3625 = vmatprep.subr.bf16.mxu0 %v3624_v44  ;;  %v321_v61 = vld [vmem:[#allocation5 + $0xf8] sm:$0xff]  ;;  %v3568_v2 = vpack.c.bf16 %v389_v60, %v386_v59  ;;  %v385_v3 = vld [vmem:[#allocation5 + $0x270] sm:$0xff]  ;;  %v323_v7 = vld [vmem:[#allocation5 + $0x108] sm:$0xff] }
  0x79   : > { %v320_v5 = vld [vmem:[#allocation5 + $0xf0] sm:$0xff]  ;;  %v3632_v6 = vpack.c.bf16 %v324_v62, %v321_v61  ;;  %v392_v8 = vld [vmem:[#allocation5 + $0x2a8] sm:$0xff]  ;;  %v395_v9 = vld [vmem:[#allocation5 + $0x2c0] sm:$0xff]  ;;  %v3570_v12 = vpack.c.bf16 %v388_v4, %v385_v3 }
  0x7a   : > { %3563 = vmatpush1.bf16.msra.mxu1 %v3562_v51  ;;  %v327_v10 = vld [vmem:[#allocation5 + $0x128] sm:$0xff]  ;;  %v330_v11 = vld [vmem:[#allocation5 + $0x140] sm:$0xff]  ;;  %v3634_v13 = vpack.c.bf16 %v323_v7, %v320_v5  ;;  %v3572_v14 = vpack.c.bf16 %v395_v9, %v392_v8  ;;  %v394_v16 = vld [vmem:[#allocation5 + $0x2b8] sm:$0xff] }
  0x7b   : > { %3627 = vmatpush1.bf16.msra.mxu0 %v3626_v52  ;;  %3565 = vmatprep.subr.bf16.mxu1 %v3564_v53  ;;  %v391_v15 = vld [vmem:[#allocation5 + $0x2a0] sm:$0xff]  ;;  %v3636_v18 = vpack.c.bf16 %v330_v11, %v327_v10  ;;  %v329_v19 = vld [vmem:[#allocation5 + $0x138] sm:$0xff]  ;;  %v401_v21 = vld [vmem:[#allocation5 + $0x2f0] sm:$0xff] }
  0x7c   : > { %3629 = vmatprep.subr.bf16.mxu0 %v3628_v57  ;;  %v326_v17 = vld [vmem:[#allocation5 + $0x120] sm:$0xff]  ;;  %v398_v20 = vld [vmem:[#allocation5 + $0x2d8] sm:$0xff]  ;;  %v336_v23 = vld [vmem:[#allocation5 + $0x170] sm:$0xff]  ;;  %v3574_v24 = vpack.c.bf16 %v394_v16, %v391_v15 }
  0x7d   : > { %v333_v22 = vld [vmem:[#allocation5 + $0x158] sm:$0xff]  ;;  %v3638_v25 = vpack.c.bf16 %v329_v19, %v326_v17  ;;  %v3576_v26 = vpack.c.bf16 %v401_v21, %v398_v20  ;;  %v397_v27 = vld [vmem:[#allocation5 + $0x2d0] sm:$0xff]  ;;  %v400_v28 = vld [vmem:[#allocation5 + $0x2e8] sm:$0xff] }
  0x7e   : > { %3567 = vmatpush1.bf16.msra.mxu1 %v3566_v63  ;;  %v3640_v29 = vpack.c.bf16 %v336_v23, %v333_v22  ;;  %v332_v30 = vld [vmem:[#allocation5 + $0x150] sm:$0xff]  ;;  %v335_v31 = vld [vmem:[#allocation5 + $0x168] sm:$0xff]  ;;  %v1036_v33 = vld [vmem:[#allocation5 + $0x320] sm:$0xff]  ;;  %v3578_v34 = vpack.c.bf16 %v400_v28, %v397_v27 }
  0x7f   : > { %3631 = vmatpush1.bf16.msra.mxu0 %v3630_v1  ;;  %3569 = vmatprep.subr.bf16.mxu1 %v3568_v2  ;;  %v1033_v32 = vld [vmem:[#allocation5 + $0x308] sm:$0xff]  ;;  %v3642_v35 = vpack.c.bf16 %v335_v31, %v332_v30  ;;  %v1032_v37 = vld [vmem:[#allocation5 + $0x300] sm:$0xff]  ;;  %v1035_v38 = vld [vmem:[#allocation5 + $0x318] sm:$0xff] }
  0x80   : > { %3633 = vmatprep.subr.bf16.mxu0 %v3632_v6  ;;  %v3676_v36 = vpack.c.bf16 %v1036_v33, %v1033_v32  ;;  %v1039_v39 = vld [vmem:[#allocation5 + $0x338] sm:$0xff]  ;;  %v1042_v40 = vld [vmem:[#allocation5 + $0x350] sm:$0xff]  ;;  %v4587_v41 = vld [vmem:[%s4574_s10 + $0x1] sm:$0xff]  ;;  %v3678_v45 = vpack.c.bf16 %v1035_v38, %v1032_v37 }
  0x81   : > { %v357_v42 = vld [vmem:[#allocation5 + $0x190] sm:$0xff]  ;;  %v360_v43 = vld [vmem:[#allocation5 + $0x1a8] sm:$0xff]  ;;  %v4590_v44 = vld [vmem:[%s4574_s10] sm:$0xff]  ;;  %v3680_v47 = vpack.c.bf16 %v1042_v40, %v1039_v39 }
  0x82   : > { %3571 = vmatpush1.bf16.msra.mxu1 %v3570_v12  ;;  %v3580_v46 = vpack.c.bf16 %v360_v43, %v357_v42  ;;  %v1038_v48 = vld [vmem:[#allocation5 + $0x330] sm:$0xff]  ;;  %v1041_v49 = vld [vmem:[#allocation5 + $0x348] sm:$0xff]  ;;  %v1048_v51 = vld [vmem:[#allocation5 + $0x380] sm:$0xff] }
  0x83   : > { %3635 = vmatpush1.bf16.msra.mxu0 %v3634_v13  ;;  %3573 = vmatprep.subr.bf16.mxu1 %v3572_v14  ;;  %v1045_v50 = vld [vmem:[#allocation5 + $0x368] sm:$0xff]  ;;  %v363_v52 = vld [vmem:[#allocation5 + $0x1c0] sm:$0xff]  ;;  %v366_v53 = vld [vmem:[#allocation5 + $0x1d8] sm:$0xff]  ;;  %v3682_v59 = vpack.c.bf16 %v1041_v49, %v1038_v48 }
  0x84   : > { %3637 = vmatprep.subr.bf16.mxu0 %v3636_v18  ;;  %v4596_v54 = vld [vmem:[%s4574_s10 + $0x9] sm:$0xff]  ;;  %v3584_v55 = vpack.c.bf16 %v366_v53, %v363_v52  ;;  %v3684_v60 = vpack.c.bf16 %v1048_v51, %v1045_v50  ;;  %v1044_v61 = vld [vmem:[#allocation5 + $0x360] sm:$0xff]  ;;  %v1047_v62 = vld [vmem:[#allocation5 + $0x378] sm:$0xff] }
  0x85   : > { %v369_v56 = vld [vmem:[#allocation5 + $0x1f0] sm:$0xff]  ;;  %v372_v57 = vld [vmem:[#allocation5 + $0x208] sm:$0xff]  ;;  %v1051_v63 = vld [vmem:[#allocation5 + $0x398] sm:$0xff]  ;;  %v3686_v7 = vpack.c.bf16 %v1047_v62, %v1044_v61 }
  0x86   : > { %3575 = vmatpush1.bf16.msra.mxu1 %v3574_v24  ;;  %v4600_v58 = vld [vmem:[%s4574_s10 + $0x8] sm:$0xff]  ;;  %v1054_v1 = vld [vmem:[#allocation5 + $0x3b0] sm:$0xff]  ;;  %v3588_v2 = vpack.c.bf16 %v372_v57, %v369_v56  ;;  %v4606_v3 = vld [vmem:[%s4574_s10 + $0x19] sm:$0xff] }
  0x87   : > { %3639 = vmatpush1.bf16.msra.mxu0 %v3638_v25  ;;  %3577 = vmatprep.subr.bf16.mxu1 %v3576_v26  ;;  %v375_v4 = vld [vmem:[#allocation5 + $0x220] sm:$0xff]  ;;  %v378_v5 = vld [vmem:[#allocation5 + $0x238] sm:$0xff]  ;;  %v3688_v8 = vpack.c.bf16 %v1054_v1, %v1051_v63  ;;  %v1050_v9 = vld [vmem:[#allocation5 + $0x390] sm:$0xff] }
  0x88   : > { %3641 = vmatprep.subr.bf16.mxu0 %v3640_v29  ;;  %v4610_v6 = vld [vmem:[%s4574_s10 + $0x18] sm:$0xff]  ;;  %v1053_v10 = vld [vmem:[#allocation5 + $0x3a8] sm:$0xff]  ;;  %v1060_v12 = vld [vmem:[#allocation5 + $0x3e0] sm:$0xff]  ;;  %v3592_v13 = vpack.c.bf16 %v378_v5, %v375_v4 }
  0x89   : > { %v1057_v11 = vld [vmem:[#allocation5 + $0x3c8] sm:$0xff]  ;;  %v381_v15 = vld [vmem:[#allocation5 + $0x250] sm:$0xff]  ;;  %v4620_v17 = vld [vmem:[%s4574_s10 + $0x20] sm:$0xff]  ;;  %v3690_v18 = vpack.c.bf16 %v1053_v10, %v1050_v9 }
  0x8a   : > { %3579 = vmatpush1.bf16.msra.mxu1 %v3578_v34  ;;  %v4616_v14 = vld [vmem:[%s4574_s10 + $0x21] sm:$0xff]  ;;  %v3692_v19 = vpack.c.bf16 %v1060_v12, %v1057_v11  ;;  %v1059_v21 = vld [vmem:[#allocation5 + $0x3d8] sm:$0xff]  ;;  %v1066_v23 = vld [vmem:[#allocation5 + $0x410] sm:$0xff] }
  0x8b   : > { %3643 = vmatpush1.bf16.msra.mxu0 %v3642_v35  ;;  %3581 = vmatprep.subr.bf16.mxu1 %v3580_v46  ;;  %v384_v16 = vld [vmem:[#allocation5 + $0x268] sm:$0xff]  ;;  %v1056_v20 = vld [vmem:[#allocation5 + $0x3c0] sm:$0xff]  ;;  %v1063_v22 = vld [vmem:[#allocation5 + $0x3f8] sm:$0xff] }
  0x8c   : > { %3677 = vmatprep.subr.bf16.mxu0 %v3676_v36  ;;  %v3596_v24 = vpack.c.bf16 %v384_v16, %v381_v15  ;;  %v4626_v25 = vld [vmem:[%s4574_s10 + $0x31] sm:$0xff]  ;;  %v387_v26 = vld [vmem:[#allocation5 + $0x280] sm:$0xff]  ;;  %v3694_v29 = vpack.c.bf16 %v1059_v21, %v1056_v20  ;;  %v3696_v30 = vpack.c.bf16 %v1066_v23, %v1063_v22  ;;  %v1065_v32 = vld [vmem:[#allocation5 + $0x408] sm:$0xff] }
  0x8d   : > { %468 = vmatmul.mubr.f32.vlgmr.msra.gmra.mrb[0].mxu1 %v4587_v41  ;;  %v390_v27 = vld [vmem:[#allocation5 + $0x298] sm:$0xff]  ;;  %v4630_v28 = vld [vmem:[%s4574_s10 + $0x30] sm:$0xff]  ;;  %v1069_v33 = vld [vmem:[#allocation5 + $0x428] sm:$0xff] }
  0x8e   : > { %774 = vmatmul.mubr.f32.vlgmr.msra.gmra.mrb[0].mxu0 %v4590_v44  ;;  %473 = vmatprep.mubr.f32.mxu1 %v5348_v0  ;;  %v1062_v31 = vld [vmem:[#allocation5 + $0x3f0] sm:$0xff]  ;;  %v1072_v34 = vld [vmem:[#allocation5 + $0x440] sm:$0xff]  ;;  %v3600_v35 = vpack.c.bf16 %v390_v27, %v387_v26  ;;  %v396_v38 = vld [vmem:[#allocation5 + $0x2c8] sm:$0xff] }
  0x8f   : > { %3679 = vmatpush1.bf16.msra.mxu0 %v3678_v45  ;;  %779 = vmatprep.mubr.f32.mxu0 %v5348_v0  ;;  %v4636_v36 = vld [vmem:[%s4574_s10 + $0x39] sm:$0xff]  ;;  %v393_v37 = vld [vmem:[#allocation5 + $0x2b0] sm:$0xff]  ;;  %v3698_v40 = vpack.c.bf16 %v1065_v32, %v1062_v31  ;;  %v3700_v42 = vpack.c.bf16 %v1072_v34, %v1069_v33  ;;  %v4650_v52 = vld [vmem:[%s4574_s10 + $0x48] sm:$0xff] }
  0x90   : > { %3681 = vmatprep.subr.bf16.mxu0 %v3680_v47  ;;  %3583 = vmatpush3.bf16.msra.mxu1 %v3580_v46  ;;  %v4640_v39 = vld [vmem:[%s4574_s10 + $0x38] sm:$0xff]  ;;  %v1068_v43 = vld [vmem:[#allocation5 + $0x420] sm:$0xff]  ;;  %v3604_v46 = vpack.c.bf16 %v396_v38, %v393_v37  ;;  %v1078_v48 = vld [vmem:[#allocation5 + $0x470] sm:$0xff] }
  0x91   : > { %474 = vmatmul.mubr.f32.gmra.mrb[2].mxu1 %v4596_v54  ;;  %3585 = vmatprep.subr.bf16.mxu1 %v3584_v55  ;;  %v1071_v45 = vld [vmem:[#allocation5 + $0x438] sm:$0xff]  ;;  %v4646_v49 = vld [vmem:[%s4574_s10 + $0x49] sm:$0xff]  ;;  %v399_v50 = vld [vmem:[#allocation5 + $0x2e0] sm:$0xff] }
  0x92   : > { %780 = vmatmul.mubr.f32.gmra.mrb[2].mxu0 %v4600_v58  ;;  %479 = vmatprep.mubr.f32.mxu1 %v5348_v0  ;;  %v1075_v47 = vld [vmem:[#allocation5 + $0x458] sm:$0xff]  ;;  %v3702_v53 = vpack.c.bf16 %v1071_v45, %v1068_v43  ;;  %v1074_v56 = vld [vmem:[#allocation5 + $0x450] sm:$0xff]  ;;  %v1077_v57 = vld [vmem:[#allocation5 + $0x468] sm:$0xff] }
  0x93   : > { %785 = vmatprep.mubr.f32.mxu0 %v5348_v0  ;;  %3683 = vmatpush1.bf16.msra.mxu0 %v3682_v59  ;;  %v402_v51 = vld [vmem:[#allocation5 + $0x2f8] sm:$0xff]  ;;  %v1455_v61 = vld [vmem:[#allocation5 + $0x4a0] sm:$0xff]  ;;  %v292_v63 = vld [vmem:[#allocation5 + $0x10] sm:$0xff]  ;;  %v3706_v4 = vpack.c.bf16 %v1077_v57, %v1074_v56 }
  0x94   : > { %3685 = vmatprep.subr.bf16.mxu0 %v3684_v60  ;;  %3587 = vmatpush3.bf16.msra.mxu1 %v3584_v55  ;;  %v3704_v55 = vpack.c.bf16 %v1078_v48, %v1075_v47  ;;  %v3608_v59 = vpack.c.bf16 %v402_v51, %v399_v50  ;;  %v1452_v60 = vld [vmem:[#allocation5 + $0x488] sm:$0xff]  ;;  %v4656_v62 = vld [vmem:[%s4574_s10 + $0x51] sm:$0xff]  ;;  %v4672_v9 = vld [vmem:[%s4574_s10 + $0x60] sm:$0xff] }
  0x95   : > { %480 = vmatmul.mubr.f32.gmra.mrb[4].mxu1 %v4606_v3  ;;  %3589 = vmatprep.subr.bf16.mxu1 %v3588_v2  ;;  %v295_v1 = vld [vmem:[#allocation5 + $0x28] sm:$0xff]  ;;  %v3740_v5 = vpack.c.bf16 %v1455_v61, %v1452_v60  ;;  %v4689_v12 = vld [vmem:[%s4574_s10 + $0x79] sm:$0xff]  ;;  %v4743_v26 = vld [vmem:[%s4574_s10 + $0xb0] sm:$0xff] }
  0x96   : > { %786 = vmatmul.mubr.f32.gmra.mrb[4].mxu0 %v4610_v6  ;;  %485 = vmatprep.mubr.f32.mxu1 %v5348_v0  ;;  %v4679_v10 = vld [vmem:[%s4574_s10 + $0x69] sm:$0xff]  ;;  %v4699_v15 = vld [vmem:[%s4574_s10 + $0x81] sm:$0xff]  ;;  %v4719_v20 = vld [vmem:[%s4574_s10 + $0x99] sm:$0xff] }
  0x97   : > { %791 = vmatprep.mubr.f32.mxu0 %v5348_v0  ;;  %3687 = vmatpush1.bf16.msra.mxu0 %v3686_v7  ;;  %v4663_v7 = vpack.c.bf16 %v295_v1, %v292_v63  ;;  %v4683_v11 = vld [vmem:[%s4574_s10 + $0x68] sm:$0xff]  ;;  %v4703_v16 = vld [vmem:[%s4574_s10 + $0x80] sm:$0xff]  ;;  %v4723_v21 = vld [vmem:[%s4574_s10 + $0x98] sm:$0xff] }
  0x98   : > { %3689 = vmatprep.subr.bf16.mxu0 %v3688_v8  ;;  %3591 = vmatpush3.bf16.msra.mxu1 %v3588_v2  ;;  %v4660_v2 = vld [vmem:[%s4574_s10 + $0x50] sm:$0xff]  ;;  %v4668_v8 = vld [vmem:[%s4574_s10 + $0x61] sm:$0xff]  ;;  %v301_v31 = vld [vmem:[#allocation5 + $0x58] sm:$0xff] }
  0x99   : > { %486 = vmatmul.mubr.f32.gmra.mrb[6].mxu1 %v4616_v14  ;;  %3593 = vmatprep.subr.bf16.mxu1 %v3592_v13  ;;  %v4729_v22 = vld [vmem:[%s4574_s10 + $0xa9] sm:$0xff]  ;;  %v1451_v27 = vld [vmem:[#allocation5 + $0x480] sm:$0xff]  ;;  %v1458_v32 = vld [vmem:[#allocation5 + $0x4b8] sm:$0xff] }
  0x9a   : > { %792 = vmatmul.mubr.f32.gmra.mrb[6].mxu0 %v4620_v17  ;;  %491 = vmatprep.mubr.f32.mxu1 %v5348_v0  ;;  %v4733_v23 = vld [vmem:[%s4574_s10 + $0xa8] sm:$0xff]  ;;  %v1461_v33 = vld [vmem:[#allocation5 + $0x4d0] sm:$0xff]  ;;  %v310_v50 = vld [vmem:[#allocation5 + $0xa0] sm:$0xff] }
  0x9b   : > { %797 = vmatprep.mubr.f32.mxu0 %v5348_v0  ;;  %3691 = vmatpush1.bf16.msra.mxu0 %v3690_v18  ;;  %v4709_v18 = vld [vmem:[%s4574_s10 + $0x91] sm:$0xff]  ;;  %v4750_v34 = vld [vmem:[%s4574_s10 + $0x2] sm:$0xff] }
  0x9c   : > { %3693 = vmatprep.subr.bf16.mxu0 %v3692_v19  ;;  %3595 = vmatpush3.bf16.msra.mxu1 %v3592_v13  ;;  %v4693_v13 = vld [vmem:[%s4574_s10 + $0x78] sm:$0xff]  ;;  %v4713_v19 = vld [vmem:[%s4574_s10 + $0x90] sm:$0xff]  ;;  %v1460_v45 = vld [vmem:[#allocation5 + $0x4c8] sm:$0xff] }
  0x9d   : > { %492 = vmatmul.mubr.f32.gmra.mrb[8].mxu1 %v4626_v25  ;;  %3597 = vmatprep.subr.bf16.mxu1 %v3596_v24  ;;  %v304_v38 = vld [vmem:[#allocation5 + $0x70] sm:$0xff]  ;;  %v313_v51 = vld [vmem:[#allocation5 + $0xb8] sm:$0xff]  ;;  %v319_v63 = vld [vmem:[#allocation5 + $0xe8] sm:$0xff] }
  0x9e   : > { %798 = vmatmul.mubr.f32.gmra.mrb[8].mxu0 %v4630_v28  ;;  %497 = vmatprep.mubr.f32.mxu1 %v5348_v0  ;;  %v1457_v43 = vld [vmem:[#allocation5 + $0x4b0] sm:$0xff]  ;;  %v1466_v56 = vld [vmem:[#allocation5 + $0x4f8] sm:$0xff] }
  0x9f   : > { %803 = vmatprep.mubr.f32.mxu0 %v5348_v0  ;;  %3695 = vmatpush1.bf16.msra.mxu0 %v3694_v29  ;;  %v1454_v29 = vld [vmem:[#allocation5 + $0x498] sm:$0xff]  ;;  %v4757_v47 = vld [vmem:[%s4574_s10 + $0xa] sm:$0xff]  ;;  %v3746_v48 = vpack.c.bf16 %v1460_v45, %v1457_v43 }
  0xa0   : > { %3697 = vmatprep.subr.bf16.mxu0 %v3696_v30  ;;  %3599 = vmatpush3.bf16.msra.mxu1 %v3596_v24  ;;  %v4739_v24 = vld [vmem:[%s4574_s10 + $0xb1] sm:$0xff]  ;;  %v298_v30 = vld [vmem:[#allocation5 + $0x40] sm:$0xff]  ;;  %v331_v43 = vld [vmem:[#allocation5 + $0x148] sm:$0xff] }
  0xa1   : > { %498 = vmatmul.mubr.f32.gmra.mrb[10].mxu1 %v4636_v36  ;;  %3601 = vmatprep.subr.bf16.mxu1 %v3600_v35  ;;  %v3648_v37 = vpack.c.bf16 %v301_v31, %v298_v30  ;;  %v1473_v57 = vld [vmem:[#allocation5 + $0x530] sm:$0xff]  ;;  %v325_v31 = vld [vmem:[#allocation5 + $0x118] sm:$0xff] }
  0xa2   : > { %804 = vmatmul.mubr.f32.gmra.mrb[10].mxu0 %v4640_v39  ;;  %503 = vmatprep.mubr.f32.mxu1 %v5348_v0  ;;  %v316_v60 = vld [vmem:[#allocation5 + $0xd0] sm:$0xff] }
  0xa3   : > { %809 = vmatprep.mubr.f32.mxu0 %v5348_v0  ;;  %3699 = vmatpush1.bf16.msra.mxu0 %v3698_v40  ;;  %v307_v40 = vld [vmem:[#allocation5 + $0x88] sm:$0xff] }
  0xa4   : > { %3701 = vmatprep.subr.bf16.mxu0 %v3700_v42  ;;  %3603 = vmatpush3.bf16.msra.mxu1 %v3600_v35  ;;  %v3742_v35 = vpack.c.bf16 %v1454_v29, %v1451_v27  ;;  %v3744_v42 = vpack.c.bf16 %v1461_v33, %v1458_v32  ;;  %v4772_v27 = vld [vmem:[%s4574_s10 + $0x22] sm:$0xff]  ;;  %v3660_v29 = vpack.c.bf16 %v319_v63, %v316_v60 }
  0xa5   : > { %504 = vmatmul.mubr.f32.gmra.mrb[12].mxu1 %v4646_v49  ;;  %3605 = vmatprep.subr.bf16.mxu1 %v3604_v46  ;;  %v1475_v33 = vld [vmem:[#allocation5 + $0x540] sm:$0xff]  ;;  %v1037_v63 = vld [vmem:[#allocation5 + $0x328] sm:$0xff] }
  0xa6   : > { %810 = vmatmul.mubr.f32.gmra.mrb[12].mxu0 %v4650_v52  ;;  %509 = vmatprep.mubr.f32.mxu1 %v5348_v0 }
  0xa7   : > { %815 = vmatprep.mubr.f32.mxu0 %v5348_v0  ;;  %3703 = vmatpush1.bf16.msra.mxu0 %v3702_v53 }
  0xa8   : > { %3705 = vmatprep.subr.bf16.mxu0 %v3704_v55  ;;  %3607 = vmatpush3.bf16.msra.mxu1 %v3604_v46  ;;  %v1467_v46 = vld [vmem:[#allocation5 + $0x500] sm:$0xff] }
  0xa9   : > { %510 = vmatmul.mubr.f32.gmra.mrb[14].mxu1 %v4656_v62  ;;  %3609 = vmatprep.subr.bf16.mxu1 %v3608_v59  ;;  %v1463_v55 = vld [vmem:[#allocation5 + $0x4e0] sm:$0xff] }
  0xaa   : > { %816 = vmatmul.mubr.f32.gmra.mrb[14].mxu0 %v4660_v2  ;;  %515 = vmatprep.mubr.f32.mxu1 %v5348_v0  ;;  %v3750_v61 = vpack.c.bf16 %v1466_v56, %v1463_v55  ;;  %v1487_v56 = vld [vmem:[#allocation5 + $0x5a0] sm:$0xff] }
  0xab   : > { %821 = vmatprep.mubr.f32.mxu0 %v5348_v0  ;;  %3707 = vmatpush1.bf16.msra.mxu0 %v3706_v4  ;;  %v1469_v4 = vld [vmem:[#allocation5 + $0x510] sm:$0xff] }
  0xac   : > { %3611 = vmatpush3.bf16.msra.mxu1 %v3608_v59  ;;  %3741 = vmatprep.subr.bf16.mxu0 %v3740_v5  ;;  %v4765_v59 = vld [vmem:[%s4574_s10 + $0x1a] sm:$0xff]  ;;  %v1472_v5 = vld [vmem:[#allocation5 + $0x528] sm:$0xff] }
  0xad   : > { %516 = vmatmul.mubr.f32.gmra.mrb[16].mxu1 %v4668_v8  ;;  %3645 = vmatprep.subr.bf16.mxu1 %v4663_v7  ;;  %v3754_v30 = vpack.c.bf16 %v1472_v5, %v1469_v4  ;;  %v1493_v4 = vld [vmem:[#allocation5 + $0x5d0] sm:$0xff]  ;;  %v1496_v5 = vld [vmem:[#allocation5 + $0x5e8] sm:$0xff] }
  0xae   : > { %822 = vmatmul.mubr.f32.gmra.mrb[16].mxu0 %v4672_v9  ;;  %521 = vmatprep.mubr.f32.mxu1 %v5348_v0 }
  0xaf   : > { %827 = vmatprep.mubr.f32.mxu0 %v5348_v0 }
  0xb1   : > { %522 = vmatmul.mubr.f32.gmra.mrb[18].mxu1 %v4679_v10 }
  0xb2   : > { %828 = vmatmul.mubr.f32.gmra.mrb[18].mxu0 %v4683_v11  ;;  %527 = vmatprep.mubr.f32.mxu1 %v5348_v0 }
  0xb3   : > { %833 = vmatprep.mubr.f32.mxu0 %v5348_v0 }
  0xb5   : > { %528 = vmatmul.mubr.f32.gmra.mrb[20].mxu1 %v4689_v12 }
  0xb6   : > { %834 = vmatmul.mubr.f32.gmra.mrb[20].mxu0 %v4693_v13  ;;  %533 = vmatprep.mubr.f32.mxu1 %v5348_v0 }
  0xb7   : > { %839 = vmatprep.mubr.f32.mxu0 %v5348_v0 }
  0xb9   : > { %534 = vmatmul.mubr.f32.gmra.mrb[22].mxu1 %v4699_v15 }
  0xba   : > { %840 = vmatmul.mubr.f32.gmra.mrb[22].mxu0 %v4703_v16  ;;  %539 = vmatprep.mubr.f32.mxu1 %v5348_v0 }
  0xbb   : > { %845 = vmatprep.mubr.f32.mxu0 %v5348_v0 }
  0xbd   : > { %540 = vmatmul.mubr.f32.gmra.mrb[24].mxu1 %v4709_v18 }
  0xbe   : > { %846 = vmatmul.mubr.f32.gmra.mrb[24].mxu0 %v4713_v19  ;;  %545 = vmatprep.mubr.f32.mxu1 %v5348_v0 }
  0xbf   : > { %851 = vmatprep.mubr.f32.mxu0 %v5348_v0 }
  0xc1   : > { %546 = vmatmul.mubr.f32.gmra.mrb[26].mxu1 %v4719_v20 }
  0xc2   : > { %852 = vmatmul.mubr.f32.gmra.mrb[26].mxu0 %v4723_v21  ;;  %551 = vmatprep.mubr.f32.mxu1 %v5348_v0 }
  0xc3   : > { %857 = vmatprep.mubr.f32.mxu0 %v5348_v0 }
  0xc5   : > { %552 = vmatmul.mubr.f32.gmra.mrb[28].mxu1 %v4729_v22 }
  0xc6   : > { %858 = vmatmul.mubr.f32.gmra.mrb[28].mxu0 %v4733_v23  ;;  %557 = vmatprep.mubr.f32.mxu1 %v5348_v0 }
  0xc7   : > { %863 = vmatprep.mubr.f32.mxu0 %v5348_v0 }
  0xc9   : > { %558 = vmatmul.mubr.f32.gmra.mrb[30].mxu1 %v4739_v24 }
  0xca   : > { %864 = vmatmul.mubr.f32.gmra.mrb[30].mxu0 %v4743_v26  ;;  %3265 = vmatprep.mubr.f32.mxu1 %v4587_v41  ;;  %v1464_v41 = vld [vmem:[#allocation5 + $0x4e8] sm:$0xff] }
  0xcb   : > { %1144 = vmatprep.mubr.f32.mxu0 %v5348_v0  ;;  %v3748_v53 = vpack.c.bf16 %v1467_v46, %v1464_v41  ;;  %v1481_v41 = vld [vmem:[#allocation5 + $0x570] sm:$0xff]  ;;  %v1484_v46 = vld [vmem:[#allocation5 + $0x588] sm:$0xff] }
  0xcd   : > { %3266 = vmatmul.mubr.f32.vlgmr.msra.gmra.mrb[32].mxu1 %v4596_v54  ;;  %v3652_v54 = vpack.c.bf16 %v307_v40, %v304_v38  ;;  %v4779_v38 = vld [vmem:[%s4574_s10 + $0x32] sm:$0xff] }
  0xce   : > { %1145 = vmatmul.mubr.f32.vlgmr.msra.gmra.mrb[0].mxu0 %v4750_v34  ;;  %3647 = vmatpush3.bf16.msra.mxu1 %v4663_v7  ;;  %v1479_v7 = vld [vmem:[#allocation5 + $0x560] sm:$0xff] }
  0xcf   : > { %3743 = vmatpush1.bf16.msra.mxu0 %v3742_v35  ;;  %3268 = vmatprep.mubr.f32.mxu1 %v4606_v3  ;;  %v1470_v3 = vld [vmem:[#allocation5 + $0x518] sm:$0xff] }
  0xd0   : > { %1150 = vmatprep.mubr.f32.mxu0 %v5348_v0  ;;  %3649 = vmatprep.subr.bf16.mxu1 %v3648_v37  ;;  %v3752_v1 = vpack.c.bf16 %v1473_v57, %v1470_v3  ;;  %v1478_v35 = vld [vmem:[#allocation5 + $0x558] sm:$0xff]  ;;  %v1497_v57 = vld [vmem:[#allocation5 + $0x5f0] sm:$0xff] }
  0xd1   : > { %3269 = vmatmul.mubr.f32.gmra.mrb[34].mxu1 %v4616_v14  ;;  %3745 = vmatprep.subr.bf16.mxu0 %v3744_v42  ;;  %v3656_v14 = vpack.c.bf16 %v313_v51, %v310_v50  ;;  %v3758_v42 = vpack.c.bf16 %v1478_v35, %v1475_v33  ;;  %v3762_v51 = vpack.c.bf16 %v1484_v46, %v1481_v41  ;;  %v1490_v3 = vld [vmem:[#allocation5 + $0x5b8] sm:$0xff]  ;;  %v1049_v33 = vld [vmem:[#allocation5 + $0x388] sm:$0xff]  ;;  %v1076_v46 = vld [vmem:[#allocation5 + $0x460] sm:$0xff] }
  0xd2   : > { %1151 = vmatmul.mubr.f32.gmra.mrb[2].mxu0 %v4757_v47  ;;  %3651 = vmatpush3.bf16.msra.mxu1 %v3648_v37  ;;  %v1485_v37 = vld [vmem:[#allocation5 + $0x590] sm:$0xff]  ;;  %v1073_v41 = vld [vmem:[#allocation5 + $0x448] sm:$0xff] }
  0xd3   : > { %3271 = vmatprep.mubr.f32.mxu1 %v4626_v25  ;;  %1156 = vmatprep.mubr.f32.mxu0 %v5348_v0  ;;  %v1476_v25 = vld [vmem:[#allocation5 + $0x548] sm:$0xff] }
  0xd4   : > { %3653 = vmatprep.subr.bf16.mxu1 %v3652_v54  ;;  %3747 = vmatpush1.bf16.msra.mxu0 %v3746_v48  ;;  %v3756_v32 = vpack.c.bf16 %v1479_v7, %v1476_v25  ;;  %v4786_v48 = vld [vmem:[%s4574_s10 + $0x3a] sm:$0xff]  ;;  %v4800_v7 = vld [vmem:[%s4574_s10 + $0x52] sm:$0xff] }
  0xd5   : > { %3272 = vmatmul.mubr.f32.gmra.mrb[36].mxu1 %v4636_v36  ;;  %3749 = vmatprep.subr.bf16.mxu0 %v3748_v53  ;;  %v322_v36 = vld [vmem:[#allocation5 + $0x100] sm:$0xff]  ;;  %v337_v53 = vld [vmem:[#allocation5 + $0x178] sm:$0xff] }
  0xd6   : > { %1157 = vmatmul.mubr.f32.gmra.mrb[4].mxu0 %v4765_v59  ;;  %3655 = vmatpush3.bf16.msra.mxu1 %v3652_v54  ;;  %v3664_v40 = vpack.c.bf16 %v325_v31, %v322_v36  ;;  %v1491_v54 = vld [vmem:[#allocation5 + $0x5c0] sm:$0xff] }
  0xd7   : > { %3274 = vmatprep.mubr.f32.mxu1 %v4646_v49  ;;  %1162 = vmatprep.mubr.f32.mxu0 %v5348_v0  ;;  %v1482_v49 = vld [vmem:[#allocation5 + $0x578] sm:$0xff]  ;;  %v1874_v25 = vld [vmem:[#allocation5 + $0x620] sm:$0xff] }
  0xd8   : > { %3657 = vmatprep.subr.bf16.mxu1 %v3656_v14  ;;  %3751 = vmatpush1.bf16.msra.mxu0 %v3750_v61  ;;  %v3760_v45 = vpack.c.bf16 %v1485_v37, %v1482_v49  ;;  %v3766_v61 = vpack.c.bf16 %v1490_v3, %v1487_v56  ;;  %v1040_v36 = vld [vmem:[#allocation5 + $0x340] sm:$0xff]  ;;  %v1880_v56 = vld [vmem:[#allocation5 + $0x650] sm:$0xff] }
  0xd9   : > { %3275 = vmatmul.mubr.f32.gmra.mrb[38].mxu1 %v4656_v62  ;;  %3753 = vmatprep.subr.bf16.mxu0 %v3752_v1  ;;  %v328_v62 = vld [vmem:[#allocation5 + $0x130] sm:$0xff]  ;;  %v1052_v49 = vld [vmem:[#allocation5 + $0x3a0] sm:$0xff] }
  0xda   : > { %1163 = vmatmul.mubr.f32.gmra.mrb[6].mxu0 %v4772_v27  ;;  %3659 = vmatpush3.bf16.msra.mxu1 %v3656_v14  ;;  %v3668_v50 = vpack.c.bf16 %v331_v43, %v328_v62  ;;  %v4793_v14 = vld [vmem:[%s4574_s10 + $0x4a] sm:$0xff]  ;;  %v4821_v37 = vld [vmem:[%s4574_s10 + $0x7a] sm:$0xff] }
  0xdb   : > { %3277 = vmatprep.mubr.f32.mxu1 %v4668_v8  ;;  %1168 = vmatprep.mubr.f32.mxu0 %v5348_v0  ;;  %v1488_v8 = vld [vmem:[#allocation5 + $0x5a8] sm:$0xff]  ;;  %v1067_v43 = vld [vmem:[#allocation5 + $0x418] sm:$0xff] }
  0xdc   : > { %3661 = vmatprep.subr.bf16.mxu1 %v3660_v29  ;;  %3755 = vmatpush1.bf16.msra.mxu0 %v3754_v30  ;;  %v3764_v55 = vpack.c.bf16 %v1491_v54, %v1488_v8  ;;  %v1043_v30 = vld [vmem:[#allocation5 + $0x358] sm:$0xff]  ;;  %v1061_v62 = vld [vmem:[#allocation5 + $0x3e8] sm:$0xff]  ;;  %v1453_v54 = vld [vmem:[#allocation5 + $0x490] sm:$0xff] }
  0xdd   : > { %3278 = vmatmul.mubr.f32.gmra.mrb[40].mxu1 %v4679_v10  ;;  %3757 = vmatprep.subr.bf16.mxu0 %v3756_v32  ;;  %v334_v10 = vld [vmem:[#allocation5 + $0x160] sm:$0xff]  ;;  %v3712_v32 = vpack.c.bf16 %v1043_v30, %v1040_v36  ;;  %v1079_v8 = vld [vmem:[#allocation5 + $0x478] sm:$0xff]  ;;  %v1892_v36 = vld [vmem:[#allocation5 + $0x6b0] sm:$0xff] }
  0xde   : > { %1169 = vmatmul.mubr.f32.gmra.mrb[8].mxu0 %v4779_v38  ;;  %3663 = vmatpush3.bf16.msra.mxu1 %v3660_v29  ;;  %v3672_v60 = vpack.c.bf16 %v337_v53, %v334_v10  ;;  %v1870_v10 = vld [vmem:[#allocation5 + $0x600] sm:$0xff] }
  0xdf   : > { %3280 = vmatprep.mubr.f32.mxu1 %v4689_v12  ;;  %1174 = vmatprep.mubr.f32.mxu0 %v5348_v0  ;;  %v1494_v12 = vld [vmem:[#allocation5 + $0x5d8] sm:$0xff]  ;;  %v1459_v53 = vld [vmem:[#allocation5 + $0x4c0] sm:$0xff] }
  0xe0   : > { %3665 = vmatprep.subr.bf16.mxu1 %v3664_v40  ;;  %3759 = vmatpush1.bf16.msra.mxu0 %v3758_v42  ;;  %v3768_v1 = vpack.c.bf16 %v1497_v57, %v1494_v12  ;;  %v1064_v42 = vld [vmem:[#allocation5 + $0x400] sm:$0xff]  ;;  %v1465_v57 = vld [vmem:[#allocation5 + $0x4f0] sm:$0xff] }
  0xe1   : > { %3281 = vmatmul.mubr.f32.gmra.mrb[42].mxu1 %v4699_v15  ;;  %3761 = vmatprep.subr.bf16.mxu0 %v3760_v45  ;;  %v1034_v15 = vld [vmem:[#allocation5 + $0x310] sm:$0xff]  ;;  %v4877_v30 = vld [vmem:[%s4574_s10 + $0x1b] sm:$0xff] }
  0xe2   : > { %1175 = vmatmul.mubr.f32.gmra.mrb[10].mxu0 %v4786_v48  ;;  %3667 = vmatpush3.bf16.msra.mxu1 %v3664_v40  ;;  %v3708_v29 = vpack.c.bf16 %v1037_v63, %v1034_v15  ;;  %v1058_v40 = vld [vmem:[#allocation5 + $0x3d0] sm:$0xff]  ;;  %v1883_v63 = vld [vmem:[#allocation5 + $0x668] sm:$0xff] }
  0xe3   : > { %3283 = vmatprep.mubr.f32.mxu1 %v4709_v18  ;;  %1180 = vmatprep.mubr.f32.mxu0 %v5348_v0  ;;  %v1871_v18 = vld [vmem:[#allocation5 + $0x608] sm:$0xff]  ;;  %v1070_v45 = vld [vmem:[#allocation5 + $0x430] sm:$0xff] }
  0xe4   : > { %3669 = vmatprep.subr.bf16.mxu1 %v3668_v50  ;;  %3763 = vmatpush1.bf16.msra.mxu0 %v3762_v51  ;;  %v3804_v31 = vpack.c.bf16 %v1874_v25, %v1871_v18  ;;  %v1873_v51 = vld [vmem:[#allocation5 + $0x618] sm:$0xff]  ;;  %v1876_v15 = vld [vmem:[#allocation5 + $0x630] sm:$0xff] }
  0xe5   : > { %3284 = vmatmul.mubr.f32.gmra.mrb[44].mxu1 %v4719_v20  ;;  %3765 = vmatprep.subr.bf16.mxu0 %v3764_v55  ;;  %v3770_v20 = vpack.c.bf16 %v1496_v5, %v1493_v4  ;;  %v1877_v55 = vld [vmem:[#allocation5 + $0x638] sm:$0xff]  ;;  %v3806_v3 = vpack.c.bf16 %v1873_v51, %v1870_v10  ;;  %v1471_v5 = vld [vmem:[#allocation5 + $0x520] sm:$0xff] }
  0xe6   : > { %1181 = vmatmul.mubr.f32.gmra.mrb[12].mxu0 %v4793_v14  ;;  %3671 = vmatpush3.bf16.msra.mxu1 %v3668_v50  ;;  %v1456_v50 = vld [vmem:[#allocation5 + $0x4a8] sm:$0xff]  ;;  %v1474_v18 = vld [vmem:[#allocation5 + $0x538] sm:$0xff] }
  0xe7   : > { %3286 = vmatprep.mubr.f32.mxu1 %v4729_v22  ;;  %1186 = vmatprep.mubr.f32.mxu0 %v5348_v0  ;;  %v4807_v22 = vld [vmem:[%s4574_s10 + $0x62] sm:$0xff] }
  0xe8   : > { %3673 = vmatprep.subr.bf16.mxu1 %v3672_v60  ;;  %3767 = vmatpush1.bf16.msra.mxu0 %v3766_v61  ;;  %v1879_v61 = vld [vmem:[#allocation5 + $0x648] sm:$0xff]  ;;  %v4898_v10 = vld [vmem:[%s4574_s10 + $0x3b] sm:$0xff] }
  0xe9   : > { %3287 = vmatmul.mubr.f32.gmra.mrb[46].mxu1 %v4739_v24  ;;  %3769 = vmatprep.subr.bf16.mxu0 %v3768_v1  ;;  %v1046_v24 = vld [vmem:[#allocation5 + $0x370] sm:$0xff] }
  0xea   : > { %1187 = vmatmul.mubr.f32.gmra.mrb[14].mxu0 %v4800_v7  ;;  %3675 = vmatpush3.bf16.msra.mxu1 %v3672_v60  ;;  %v3716_v35 = vpack.c.bf16 %v1049_v33, %v1046_v24  ;;  %v3808_v60 = vpack.c.bf16 %v1880_v56, %v1877_v55  ;;  %v4869_v1 = vld [vmem:[%s4574_s10 + $0xb] sm:$0xff]  ;;  %v1906_v56 = vld [vmem:[#allocation5 + $0x720] sm:$0xff] }
  0xeb   : > { %3321 = vmatprep.mubr.f32.mxu1 %v4590_v44  ;;  %1192 = vmatprep.mubr.f32.mxu0 %v5348_v0  ;;  %v4814_v44 = vld [vmem:[%s4574_s10 + $0x6a] sm:$0xff] }
  0xec   : > { %3709 = vmatprep.subr.bf16.mxu1 %v3708_v29  ;;  %3771 = vmatpush1.bf16.msra.mxu0 %v3770_v20  ;;  %v1885_v20 = vld [vmem:[#allocation5 + $0x678] sm:$0xff]  ;;  %v1480_v24 = vld [vmem:[#allocation5 + $0x568] sm:$0xff] }
  0xed   : > { %3322 = vmatmul.mubr.f32.vlgmr.msra.gmra.mrb[32].mxu1 %v4600_v58  ;;  %3805 = vmatprep.subr.bf16.mxu0 %v3804_v31  ;;  %v1055_v58 = vld [vmem:[#allocation5 + $0x3b8] sm:$0xff]  ;;  %v1477_v31 = vld [vmem:[#allocation5 + $0x550] sm:$0xff] }
  0xee   : > { %1193 = vmatmul.mubr.f32.gmra.mrb[16].mxu0 %v4807_v22  ;;  %3711 = vmatpush3.bf16.msra.mxu1 %v3708_v29  ;;  %v1882_v29 = vld [vmem:[#allocation5 + $0x660] sm:$0xff] }
  0xef   : > { %3324 = vmatprep.mubr.f32.mxu1 %v4610_v6  ;;  %1198 = vmatprep.mubr.f32.mxu0 %v5348_v0  ;;  %v3720_v6 = vpack.c.bf16 %v1055_v58, %v1052_v49  ;;  %v1891_v49 = vld [vmem:[#allocation5 + $0x6a8] sm:$0xff]  ;;  %v1898_v58 = vld [vmem:[#allocation5 + $0x6e0] sm:$0xff] }
  0xf0   : > { %3713 = vmatprep.subr.bf16.mxu1 %v3712_v32 }
  0xf1   : > { %3325 = vmatmul.mubr.f32.gmra.mrb[34].mxu1 %v4620_v17  ;;  %v4828_v17 = vld [vmem:[%s4574_s10 + $0x82] sm:$0xff] }
  0xf2   : > { %1199 = vmatmul.mubr.f32.gmra.mrb[18].mxu0 %v4814_v44  ;;  %3715 = vmatpush3.bf16.msra.mxu1 %v3712_v32  ;;  %v3814_v32 = vpack.c.bf16 %v1885_v20, %v1882_v29  ;;  %v1887_v29 = vld [vmem:[#allocation5 + $0x688] sm:$0xff] }
  0xf3   : > { %3327 = vmatprep.mubr.f32.mxu1 %v4630_v28  ;;  %1204 = vmatprep.mubr.f32.mxu0 %v5348_v0  ;;  %v3724_v28 = vpack.c.bf16 %v1061_v62, %v1058_v40  ;;  %v3788_v40 = vpack.c.bf16 %v1480_v24, %v1477_v31  ;;  %v1445_v31 = vld [vmem:[%s4574_s10 + $0x83] sm:$0xff] }
  0xf4   : > { %3717 = vmatprep.subr.bf16.mxu1 %v3716_v35  ;;  %v1902_v24 = vld [vmem:[#allocation5 + $0x700] sm:$0xff] }
  0xf5   : > { %3328 = vmatmul.mubr.f32.gmra.mrb[36].mxu1 %v4640_v39  ;;  %v4835_v39 = vld [vmem:[%s4574_s10 + $0x92] sm:$0xff] }
  0xf6   : > { %1205 = vmatmul.mubr.f32.gmra.mrb[20].mxu0 %v4821_v37  ;;  %3719 = vmatpush3.bf16.msra.mxu1 %v3716_v35  ;;  %v1888_v35 = vld [vmem:[#allocation5 + $0x690] sm:$0xff] }
  0xf7   : > { %3330 = vmatprep.mubr.f32.mxu1 %v4650_v52  ;;  %1210 = vmatprep.mubr.f32.mxu0 %v5348_v0  ;;  %v3728_v52 = vpack.c.bf16 %v1067_v43, %v1064_v42  ;;  %v3818_v62 = vpack.c.bf16 %v1891_v49, %v1888_v35  ;;  %v1894_v43 = vld [vmem:[#allocation5 + $0x6c0] sm:$0xff]  ;;  %v1446_v35 = vld [vmem:[%s4574_s10 + $0x93] sm:$0xff] }
  0xf8   : > { %3721 = vmatprep.subr.bf16.mxu1 %v3720_v6 }
  0xf9   : > { %3331 = vmatmul.mubr.f32.gmra.mrb[38].mxu1 %v4660_v2  ;;  %v4842_v2 = vld [vmem:[%s4574_s10 + $0x9a] sm:$0xff] }
  0xfa   : > { %1211 = vmatmul.mubr.f32.gmra.mrb[22].mxu0 %v4828_v17  ;;  %3723 = vmatpush3.bf16.msra.mxu1 %v3720_v6  ;;  %v4884_v6 = vld [vmem:[%s4574_s10 + $0x23] sm:$0xff] }
  0xfb   : > { %3333 = vmatprep.mubr.f32.mxu1 %v4672_v9  ;;  %1216 = vmatprep.mubr.f32.mxu0 %v5348_v0  ;;  %v3732_v9 = vpack.c.bf16 %v1073_v41, %v1070_v45  ;;  %v1904_v45 = vld [vmem:[#allocation5 + $0x710] sm:$0xff] }
  0xfc   : > { %3725 = vmatprep.subr.bf16.mxu1 %v3724_v28  ;;  %v4891_v41 = vld [vmem:[%s4574_s10 + $0x33] sm:$0xff] }
  0xfd   : > { %3334 = vmatmul.mubr.f32.gmra.mrb[40].mxu1 %v4683_v11  ;;  %v4849_v11 = vld [vmem:[%s4574_s10 + $0xaa] sm:$0xff] }
  0xfe   : > { %1217 = vmatmul.mubr.f32.gmra.mrb[24].mxu0 %v4835_v39  ;;  %3727 = vmatpush3.bf16.msra.mxu1 %v3724_v28  ;;  %v1486_v28 = vld [vmem:[#allocation5 + $0x598] sm:$0xff] }
  0xff   : > { %3336 = vmatprep.mubr.f32.mxu1 %v4693_v13  ;;  %1222 = vmatprep.mubr.f32.mxu0 %v5348_v0  ;;  %v3736_v13 = vpack.c.bf16 %v1079_v8, %v1076_v46  ;;  %v1492_v8 = vld [vmem:[#allocation5 + $0x5c8] sm:$0xff] }
 0x100   : > { %3729 = vmatprep.subr.bf16.mxu1 %v3728_v52 }
 0x101   : > { %3337 = vmatmul.mubr.f32.gmra.mrb[42].mxu1 %v4703_v16  ;;  %v4856_v16 = vld [vmem:[%s4574_s10 + $0xb2] sm:$0xff] }
 0x102   : > { %1223 = vmatmul.mubr.f32.gmra.mrb[26].mxu0 %v4842_v2  ;;  %3731 = vmatpush3.bf16.msra.mxu1 %v3728_v52  ;;  %v1897_v52 = vld [vmem:[#allocation5 + $0x6d8] sm:$0xff] }
 0x103   : > { %3339 = vmatprep.mubr.f32.mxu1 %v4713_v19  ;;  %1228 = vmatprep.mubr.f32.mxu0 %v5348_v0  ;;  %v3772_v19 = vpack.c.bf16 %v1456_v50, %v1453_v54  ;;  %v3822_v46 = vpack.c.bf16 %v1897_v52, %v1894_v43  ;;  %v1900_v54 = vld [vmem:[#allocation5 + $0x6f0] sm:$0xff]  ;;  %v1903_v50 = vld [vmem:[#allocation5 + $0x708] sm:$0xff] }
 0x104   : > { %3733 = vmatprep.subr.bf16.mxu1 %v3732_v9  ;;  %v1449_v43 = vld [vmem:[%s4574_s10 + $0xb3] sm:$0xff]  ;;  %v1853_v52 = vld [vmem:[%s4574_s10 + $0x4] sm:$0xff] }
 0x105   : > { %3340 = vmatmul.mubr.f32.gmra.mrb[44].mxu1 %v4723_v21  ;;  %v1462_v21 = vld [vmem:[#allocation5 + $0x4d8] sm:$0xff] }
 0x106   : > { %1229 = vmatmul.mubr.f32.gmra.mrb[28].mxu0 %v4849_v11  ;;  %3735 = vmatpush3.bf16.msra.mxu1 %v3732_v9  ;;  %v3776_v12 = vpack.c.bf16 %v1462_v21, %v1459_v53  ;;  %v3826_v53 = vpack.c.bf16 %v1903_v50, %v1900_v54  ;;  %v1498_v21 = vld [vmem:[#allocation5 + $0x5f8] sm:$0xff]  ;;  %v1862_v54 = vld [vmem:[%s4574_s10 + $0x6c] sm:$0xff] }
 0x107   : > { %3342 = vmatprep.mubr.f32.mxu1 %v4733_v23  ;;  %1234 = vmatprep.mubr.f32.mxu0 %v5348_v0  ;;  %v4863_v23 = vld [vmem:[%s4574_s10 + $0x3] sm:$0xff] }
 0x108   : > { %3737 = vmatprep.subr.bf16.mxu1 %v3736_v13  ;;  %v1863_v50 = vld [vmem:[%s4574_s10 + $0x7c] sm:$0xff] }
 0x109   : > { %3343 = vmatmul.mubr.f32.gmra.mrb[46].mxu1 %v4743_v26  ;;  %v1468_v26 = vld [vmem:[#allocation5 + $0x508] sm:$0xff] }
 0x10a   : > { %1235 = vmatmul.mubr.f32.gmra.mrb[30].mxu0 %v4856_v16  ;;  %3739 = vmatpush3.bf16.msra.mxu1 %v3736_v13  ;;  %v3780_v4 = vpack.c.bf16 %v1468_v26, %v1465_v57  ;;  %v1440_v57 = vld [vmem:[%s4574_s10 + $0x4b] sm:$0xff] }
 0x10b   : > { %3377 = vmatprep.mubr.f32.mxu1 %v4750_v34  ;;  %1563 = vmatprep.mubr.f32.mxu0 %v5348_v0  ;;  %v1886_v34 = vld [vmem:[#allocation5 + $0x680] sm:$0xff] }
 0x10c   : > { %3773 = vmatprep.subr.bf16.mxu1 %v3772_v19  ;;  %v3812_v25 = vpack.c.bf16 %v1886_v34, %v1883_v63  ;;  %v1912_v63 = vld [vmem:[#allocation5 + $0x750] sm:$0xff]  ;;  %v1915_v34 = vld [vmem:[#allocation5 + $0x768] sm:$0xff] }
 0x10d   : > { %3378 = vmatmul.mubr.f32.vlgmr.msra.gmra.mrb[32].mxu1 %v4757_v47  ;;  %v3810_v47 = vpack.c.bf16 %v1879_v61, %v1876_v15  ;;  %v1875_v15 = vld [vmem:[#allocation5 + $0x628] sm:$0xff] }
 0x10e   : > { %1564 = vmatmul.mubr.f32.vlgmr.msra.gmra.mrb[0].mxu0 %v4863_v23  ;;  %3775 = vmatpush3.bf16.msra.mxu1 %v3772_v19  ;;  %v1910_v19 = vld [vmem:[#allocation5 + $0x740] sm:$0xff] }
 0x10f   : > { %3807 = vmatpush1.bf16.msra.mxu0 %v3806_v3  ;;  %3380 = vmatprep.mubr.f32.mxu1 %v4765_v59  ;;  %v1889_v59 = vld [vmem:[#allocation5 + $0x698] sm:$0xff] }
 0x110   : > { %1569 = vmatprep.mubr.f32.mxu0 %v5348_v0  ;;  %3777 = vmatprep.subr.bf16.mxu1 %v3776_v12  ;;  %v3816_v33 = vpack.c.bf16 %v1892_v36, %v1889_v59  ;;  %v1909_v3 = vld [vmem:[#allocation5 + $0x738] sm:$0xff] }
 0x111   : > { %3381 = vmatmul.mubr.f32.gmra.mrb[34].mxu1 %v4772_v27  ;;  %3809 = vmatprep.subr.bf16.mxu0 %v3808_v60  ;;  %v3784_v27 = vpack.c.bf16 %v1474_v18, %v1471_v5  ;;  %v1872_v60 = vld [vmem:[#allocation5 + $0x610] sm:$0xff]  ;;  %v1881_v5 = vld [vmem:[#allocation5 + $0x658] sm:$0xff] }
 0x112   : > { %1570 = vmatmul.mubr.f32.gmra.mrb[2].mxu0 %v4869_v1  ;;  %3779 = vmatpush3.bf16.msra.mxu1 %v3776_v12  ;;  %v1916_v12 = vld [vmem:[#allocation5 + $0x770] sm:$0xff]  ;;  %v1893_v59 = vld [vmem:[#allocation5 + $0x6b8] sm:$0xff] }
 0x113   : > { %3383 = vmatprep.mubr.f32.mxu1 %v4779_v38  ;;  %1575 = vmatprep.mubr.f32.mxu0 %v5348_v0  ;;  %v1895_v38 = vld [vmem:[#allocation5 + $0x6c8] sm:$0xff] }
 0x114   : > { %3781 = vmatprep.subr.bf16.mxu1 %v3780_v4  ;;  %3811 = vmatpush1.bf16.msra.mxu0 %v3810_v47  ;;  %v3820_v42 = vpack.c.bf16 %v1898_v58, %v1895_v38  ;;  %v3834_v47 = vpack.c.bf16 %v1915_v34, %v1912_v63  ;;  %v1908_v38 = vld [vmem:[#allocation5 + $0x730] sm:$0xff]  ;;  %v1911_v58 = vld [vmem:[#allocation5 + $0x748] sm:$0xff] }
 0x115   : > { %3384 = vmatmul.mubr.f32.gmra.mrb[36].mxu1 %v4786_v48  ;;  %3813 = vmatprep.subr.bf16.mxu0 %v3812_v25  ;;  %v1483_v48 = vld [vmem:[#allocation5 + $0x580] sm:$0xff]  ;;  %v1884_v25 = vld [vmem:[#allocation5 + $0x670] sm:$0xff] }
 0x116   : > { %1576 = vmatmul.mubr.f32.gmra.mrb[4].mxu0 %v4877_v30  ;;  %3783 = vmatpush3.bf16.msra.mxu1 %v3780_v4  ;;  %v3792_v9 = vpack.c.bf16 %v1486_v28, %v1483_v48  ;;  %v3836_v4 = vpack.c.bf16 %v1875_v15, %v1872_v60  ;;  %v3844_v20 = vpack.c.bf16 %v1887_v29, %v1884_v25  ;;  %v1914_v48 = vld [vmem:[#allocation5 + $0x760] sm:$0xff]  ;;  %v1448_v28 = vld [vmem:[%s4574_s10 + $0xab] sm:$0xff] }
 0x117   : > { %3386 = vmatprep.mubr.f32.mxu1 %v4793_v14  ;;  %1581 = vmatprep.mubr.f32.mxu0 %v5348_v0  ;;  %v1901_v14 = vld [vmem:[#allocation5 + $0x6f8] sm:$0xff] }
 0x118   : > { %3785 = vmatprep.subr.bf16.mxu1 %v3784_v27  ;;  %3815 = vmatpush1.bf16.msra.mxu0 %v3814_v32  ;;  %v3824_v13 = vpack.c.bf16 %v1904_v45, %v1901_v14  ;;  %v1854_v14 = vld [vmem:[%s4574_s10 + $0xc] sm:$0xff]  ;;  %v1855_v45 = vld [vmem:[%s4574_s10 + $0x1c] sm:$0xff] }
 0x119   : > { %3387 = vmatmul.mubr.f32.gmra.mrb[38].mxu1 %v4800_v7  ;;  %3817 = vmatprep.subr.bf16.mxu0 %v3816_v33  ;;  %v1489_v7 = vld [vmem:[#allocation5 + $0x5b0] sm:$0xff]  ;;  %v1905_v33 = vld [vmem:[#allocation5 + $0x718] sm:$0xff] }
 0x11a   : > { %1582 = vmatmul.mubr.f32.gmra.mrb[6].mxu0 %v4884_v6  ;;  %3787 = vmatpush3.bf16.msra.mxu1 %v3784_v27  ;;  %v3796_v51 = vpack.c.bf16 %v1492_v8, %v1489_v7  ;;  %v1899_v27 = vld [vmem:[#allocation5 + $0x6e8] sm:$0xff]  ;;  %v3856_v49 = vpack.c.bf16 %v1905_v33, %v1902_v24  ;;  %v1858_v7 = vld [vmem:[%s4574_s10 + $0x3c] sm:$0xff]  ;;  %v1860_v8 = vld [vmem:[%s4574_s10 + $0x54] sm:$0xff] }
 0x11b   : > { %3389 = vmatprep.mubr.f32.mxu1 %v4807_v22  ;;  %1587 = vmatprep.mubr.f32.mxu0 %v5348_v0  ;;  %v1907_v22 = vld [vmem:[#allocation5 + $0x728] sm:$0xff]  ;;  %v2650_v33 = vld [vmem:[#allocation7] sm:$0xff] }
 0x11c   : > { %3789 = vmatprep.subr.bf16.mxu1 %v3788_v40  ;;  %3819 = vmatpush1.bf16.msra.mxu0 %v3818_v62  ;;  %v3828_v55 = vpack.c.bf16 %v1910_v19, %v1907_v22  ;;  %v1917_v62 = vld [vmem:[#allocation5 + $0x778] sm:$0xff]  ;;  %v1864_v22 = vld [vmem:[%s4574_s10 + $0x84] sm:$0xff] }
 0x11d   : > { %3390 = vmatmul.mubr.f32.gmra.mrb[40].mxu1 %v4814_v44  ;;  %3821 = vmatprep.subr.bf16.mxu0 %v3820_v42  ;;  %v1495_v44 = vld [vmem:[#allocation5 + $0x5e0] sm:$0xff]  ;;  %v3864_v42 = vpack.c.bf16 %v1917_v62, %v1914_v48  ;;  %v1865_v19 = vld [vmem:[%s4574_s10 + $0x94] sm:$0xff] }
 0x11e   : > { %1588 = vmatmul.mubr.f32.gmra.mrb[8].mxu0 %v4891_v41  ;;  %3791 = vmatpush3.bf16.msra.mxu1 %v3788_v40  ;;  %v3800_v26 = vpack.c.bf16 %v1498_v21, %v1495_v44  ;;  %v3860_v40 = vpack.c.bf16 %v1911_v58, %v1908_v38  ;;  %v1866_v44 = vld [vmem:[%s4574_s10 + $0x9c] sm:$0xff]  ;;  %v2668_v38 = vld [vmem:[#allocation7 + $0x90] sm:$0xff] }
 0x11f   : > { %3392 = vmatprep.mubr.f32.mxu1 %v4821_v37  ;;  %1593 = vmatprep.mubr.f32.mxu0 %v5348_v0  ;;  %v1913_v37 = vld [vmem:[#allocation5 + $0x758] sm:$0xff] }
 0x120   : > { %3793 = vmatprep.subr.bf16.mxu1 %v3792_v9  ;;  %3823 = vmatpush1.bf16.msra.mxu0 %v3822_v46  ;;  %v3832_v61 = vpack.c.bf16 %v1916_v12, %v1913_v37  ;;  %v1859_v46 = vld [vmem:[%s4574_s10 + $0x4c] sm:$0xff]  ;;  %v2669_v58 = vld [vmem:[#allocation7 + $0x98] sm:$0xff] }
 0x121   : > { %3393 = vmatmul.mubr.f32.gmra.mrb[42].mxu1 %v4828_v17  ;;  %3825 = vmatprep.subr.bf16.mxu0 %v3824_v13  ;;  %v3830_v17 = vpack.c.bf16 %v1909_v3, %v1906_v56  ;;  %v1861_v13 = vld [vmem:[%s4574_s10 + $0x64] sm:$0xff]  ;;  %v1868_v56 = vld [vmem:[%s4574_s10 + $0xb4] sm:$0xff] }
 0x122   : > { %1594 = vmatmul.mubr.f32.gmra.mrb[10].mxu0 %v4898_v10  ;;  %3795 = vmatpush3.bf16.msra.mxu1 %v3792_v9  ;;  %v1857_v9 = vld [vmem:[%s4574_s10 + $0x34] sm:$0xff] }
 0x123   : > { %3395 = vmatprep.mubr.f32.mxu1 %v4835_v39  ;;  %1599 = vmatprep.mubr.f32.mxu0 %v5348_v0  ;;  %v1441_v39 = vld [vmem:[%s4574_s10 + $0x53] sm:$0xff] }
 0x124   : > { %3797 = vmatprep.subr.bf16.mxu1 %v3796_v51  ;;  %3827 = vmatpush1.bf16.msra.mxu0 %v3826_v53  ;;  %v1867_v53 = vld [vmem:[%s4574_s10 + $0xac] sm:$0xff]  ;;  %v2653_v48 = vld [vmem:[#allocation7 + $0x18] sm:$0xff] }
 0x125   : > { %3396 = vmatmul.mubr.f32.gmra.mrb[44].mxu1 %v4842_v2  ;;  %3829 = vmatprep.subr.bf16.mxu0 %v3828_v55  ;;  %v1878_v2 = vld [vmem:[#allocation5 + $0x640] sm:$0xff] }
 0x126   : > { %1600 = vmatmul.mubr.f32.gmra.mrb[12].mxu0 %v1440_v57  ;;  %3799 = vmatpush3.bf16.msra.mxu1 %v3796_v51  ;;  %v3840_v18 = vpack.c.bf16 %v1881_v5, %v1878_v2 }
 0x127   : > { %3398 = vmatprep.mubr.f32.mxu1 %v4849_v11  ;;  %1605 = vmatprep.mubr.f32.mxu0 %v5348_v0  ;;  %v1442_v11 = vld [vmem:[%s4574_s10 + $0x63] sm:$0xff] }
 0x128   : > { %3801 = vmatprep.subr.bf16.mxu1 %v3800_v26  ;;  %3831 = vmatpush1.bf16.msra.mxu0 %v3830_v17 }
 0x129   : > { %3399 = vmatmul.mubr.f32.gmra.mrb[46].mxu1 %v4856_v16  ;;  %3833 = vmatprep.subr.bf16.mxu0 %v3832_v61  ;;  %v1443_v16 = vld [vmem:[%s4574_s10 + $0x6b] sm:$0xff] }
 0x12a   : > { %1606 = vmatmul.mubr.f32.gmra.mrb[14].mxu0 %v1441_v39  ;;  %3803 = vmatpush3.bf16.msra.mxu1 %v3800_v26 }
 0x12b   : > { %1611 = vmatprep.mubr.f32.mxu0 %v5348_v0  ;;  %3433 = vmatprep.mubr.f32.mxu1 %v4863_v23  ;;  %v1890_v23 = vld [vmem:[#allocation5 + $0x6a0] sm:$0xff] }
 0x12c   : > { %3837 = vmatprep.subr.bf16.mxu1 %v3836_v4  ;;  %3835 = vmatpush1.bf16.msra.mxu0 %v3834_v47  ;;  %v3848_v36 = vpack.c.bf16 %v1893_v59, %v1890_v23 }
 0x12d   : > { %3434 = vmatmul.mubr.f32.vlgmr.msra.gmra.mrb[32].mxu1 %v4869_v1  ;;  %v1444_v1 = vld [vmem:[%s4574_s10 + $0x7b] sm:$0xff] }
 0x12e   : > { %1612 = vmatmul.mubr.f32.gmra.mrb[16].mxu0 %v1442_v11  ;;  %3839 = vmatpush3.bf16.msra.mxu1 %v3836_v4 }
 0x12f   : > { %1617 = vmatprep.mubr.f32.mxu0 %v5348_v0  ;;  %3436 = vmatprep.mubr.f32.mxu1 %v4877_v30  ;;  %v1896_v30 = vld [vmem:[#allocation5 + $0x6d0] sm:$0xff] }
 0x130   : > { %3841 = vmatprep.subr.bf16.mxu1 %v3840_v18  ;;  %v3852_v32 = vpack.c.bf16 %v1899_v27, %v1896_v30 }
 0x131   : > { %3437 = vmatmul.mubr.f32.gmra.mrb[34].mxu1 %v4884_v6  ;;  %v1447_v6 = vld [vmem:[%s4574_s10 + $0x9b] sm:$0xff] }
 0x132   : > { %1618 = vmatmul.mubr.f32.gmra.mrb[18].mxu0 %v1443_v16  ;;  %3843 = vmatpush3.bf16.msra.mxu1 %v3840_v18 }
 0x133   : > { %1623 = vmatprep.mubr.f32.mxu0 %v5348_v0  ;;  %3439 = vmatprep.mubr.f32.mxu1 %v4891_v41  ;;  %v1856_v41 = vld [vmem:[%s4574_s10 + $0x24] sm:$0xff]  ;;  %s4285_s10 = scalar_lea.vmem %s4284_s9, 256 }
 0x134   : > { %3845 = vmatprep.subr.bf16.mxu1 %v3844_v20  ;;  %p4287_p9 = scmp.lt.s32.totalorder %s4285_s10, %s4279_s6 }
 0x135   : > { %3440 = vmatmul.mubr.f32.gmra.mrb[36].mxu1 %v4898_v10 }
 0x136   : > { %1624 = vmatmul.mubr.f32.gmra.mrb[20].mxu0 %v1444_v1  ;;  %3847 = vmatpush3.bf16.msra.mxu1 %v3844_v20  ;;  %p4288_p12 = por %p4287_p9, %p4286_p5 }
 0x137   : > { %1629 = vmatprep.mubr.f32.mxu0 %v5348_v0  ;;  %3442 = vmatprep.mubr.f32.mxu1 %v1440_v57 }
 0x138   : > { %3849 = vmatprep.subr.bf16.mxu1 %v3848_v36  ;;  %p4289_p2 = pnand %p4288_p12, %p4282_p3 }
 0x139   : > { %3443 = vmatmul.mubr.f32.gmra.mrb[38].mxu1 %v1441_v39 }
 0x13a   : > { %1630 = vmatmul.mubr.f32.gmra.mrb[22].mxu0 %v1445_v31  ;;  %3851 = vmatpush3.bf16.msra.mxu1 %v3848_v36 }
 0x13b   : > { %1635 = vmatprep.mubr.f32.mxu0 %v5348_v0  ;;  %3445 = vmatprep.mubr.f32.mxu1 %v1442_v11 }
 0x13c   : > { %3853 = vmatprep.subr.bf16.mxu1 %v3852_v32 }
 0x13d   : > { %3446 = vmatmul.mubr.f32.gmra.mrb[40].mxu1 %v1443_v16 }
 0x13e   : > { %1636 = vmatmul.mubr.f32.gmra.mrb[24].mxu0 %v1446_v35  ;;  %3855 = vmatpush3.bf16.msra.mxu1 %v3852_v32  ;;  %v2667_v32 = vld [vmem:[#allocation7 + $0x88] sm:$0xff] }
 0x13f   : > { %1641 = vmatprep.mubr.f32.mxu0 %v5348_v0  ;;  %3448 = vmatprep.mubr.f32.mxu1 %v1444_v1 }
 0x140   : > { %3857 = vmatprep.subr.bf16.mxu1 %v3856_v49 }
 0x141   : > { %3449 = vmatmul.mubr.f32.gmra.mrb[42].mxu1 %v1445_v31  ;;  %v2666_v31 = vld [vmem:[#allocation7 + $0x80] sm:$0xff] }
 0x142   : > { %1642 = vmatmul.mubr.f32.gmra.mrb[26].mxu0 %v1447_v6  ;;  %3859 = vmatpush3.bf16.msra.mxu1 %v3856_v49  ;;  %v3868_v24 = vpack.c.bf16 %v2667_v32, %v2666_v31  ;;  %v2677_v31 = vld [vmem:[#allocation7 + $0xd8] sm:$0xff] }
 0x143   : > { %1647 = vmatprep.mubr.f32.mxu0 %v5348_v0  ;;  %3451 = vmatprep.mubr.f32.mxu1 %v1446_v35  ;;  %v2651_v35 = vld [vmem:[#allocation7 + $0x8] sm:$0xff] }
 0x144   : > { %3861 = vmatprep.subr.bf16.mxu1 %v3860_v40  ;;  %v3870_v49 = vpack.c.bf16 %v2651_v35, %v2650_v33  ;;  %v2661_v33 = vld [vmem:[#allocation7 + $0x58] sm:$0xff] }
 0x145   : > { %3452 = vmatmul.mubr.f32.gmra.mrb[44].mxu1 %v1447_v6  ;;  %v3872_v6 = vpack.c.bf16 %v2669_v58, %v2668_v38  ;;  %v2679_v38 = vld [vmem:[#allocation7 + $0xe8] sm:$0xff] }
 0x146   : > { %1648 = vmatmul.mubr.f32.gmra.mrb[28].mxu0 %v1448_v28  ;;  %3863 = vmatpush3.bf16.msra.mxu1 %v3860_v40  ;;  %v2652_v40 = vld [vmem:[#allocation7 + $0x10] sm:$0xff] }
 0x147   : > { %1653 = vmatprep.mubr.f32.mxu0 %v5348_v0  ;;  %3454 = vmatprep.mubr.f32.mxu1 %v1448_v28  ;;  %v3874_v62 = vpack.c.bf16 %v2653_v48, %v2652_v40  ;;  %v2670_v28 = vld [vmem:[#allocation7 + $0xa0] sm:$0xff]  ;;  %v2663_v40 = vld [vmem:[#allocation7 + $0x68] sm:$0xff]  ;;  %v2680_v48 = vld [vmem:[#allocation7 + $0xf0] sm:$0xff] }
 0x148   : > { %3865 = vmatprep.subr.bf16.mxu1 %v3864_v42 }
 0x149   : > { %3455 = vmatmul.mubr.f32.gmra.mrb[46].mxu1 %v1449_v43 }
 0x14a   : > { %1654 = vmatmul.mubr.f32.gmra.mrb[30].mxu0 %v1449_v43  ;;  %3867 = vmatpush3.bf16.msra.mxu1 %v3864_v42  ;;  %v2671_v42 = vld [vmem:[#allocation7 + $0xa8] sm:$0xff] }
 0x14b   : > { %1982 = vmatprep.mubr.f32.mxu0 %v5348_v0  ;;  %3489 = vmatprep.mubr.f32.mxu1 %v1853_v52  ;;  %v3876_v43 = vpack.c.bf16 %v2671_v42, %v2670_v28  ;;  %v2681_v28 = vld [vmem:[#allocation7 + $0xf8] sm:$0xff]  ;;  %v2664_v42 = vld [vmem:[#allocation7 + $0x70] sm:$0xff] }
 0x14c   : > { %3869 = vmatprep.subr.bf16.mxu1 %v3868_v24  ;;  %v2660_v24 = vld [vmem:[#allocation7 + $0x50] sm:$0xff] }
 0x14d   : > { %3490 = vmatmul.mubr.f32.vlgmr.msra.gmra.mrb[32].mxu1 %v1854_v14  ;;  %v3890_v35 = vpack.c.bf16 %v2661_v33, %v2660_v24 }
 0x14e   : > { %1983 = vmatmul.mubr.f32.vlgmr.msra.gmra.mrb[0].mxu0 %v1853_v52  ;;  %3492 = vmatprep.mubr.f32.mxu1 %v1855_v45  ;;  %v2654_v52 = vld [vmem:[#allocation7 + $0x20] sm:$0xff] }
 0x14f   : > { %1988 = vmatprep.mubr.f32.mxu0 %v5348_v0  ;;  %3871 = vmatpush3.bf16.msra.mxu1 %v3870_v49  ;;  %v2678_v49 = vld [vmem:[#allocation7 + $0xe0] sm:$0xff] }
 0x150   : > { %3873 = vmatprep.subr.bf16.mxu1 %v3872_v6  ;;  %v3892_v58 = vpack.c.bf16 %v2679_v38, %v2678_v49  ;;  %v2662_v6 = vld [vmem:[#allocation7 + $0x60] sm:$0xff] }
 0x151   : > { %3493 = vmatmul.mubr.f32.gmra.mrb[34].mxu1 %v1856_v41 }
 0x152   : > { %1989 = vmatmul.mubr.f32.gmra.mrb[2].mxu0 %v1854_v14  ;;  %3495 = vmatprep.mubr.f32.mxu1 %v1857_v9  ;;  %v2655_v14 = vld [vmem:[#allocation7 + $0x28] sm:$0xff] }
 0x153   : > { %1994 = vmatprep.mubr.f32.mxu0 %v5348_v0  ;;  %3875 = vmatpush3.bf16.msra.mxu1 %v3874_v62  ;;  %v3894_v62 = vpack.c.bf16 %v2663_v40, %v2662_v6 }
 0x154   : > { %3877 = vmatprep.subr.bf16.mxu1 %v3876_v43  ;;  %v2665_v43 = vld [vmem:[#allocation7 + $0x78] sm:$0xff] }
 0x155   : > { %3496 = vmatmul.mubr.f32.gmra.mrb[36].mxu1 %v1858_v7 }
 0x156   : > { %1995 = vmatmul.mubr.f32.gmra.mrb[4].mxu0 %v1855_v45  ;;  %3498 = vmatprep.mubr.f32.mxu1 %v1859_v46  ;;  %v3878_v45 = vpack.c.bf16 %v2655_v14, %v2654_v52  ;;  %v3896_v52 = vpack.c.bf16 %v2681_v28, %v2680_v48  ;;  %v3898_v14 = vpack.c.bf16 %v2665_v43, %v2664_v42 }
 0x157   : > { %2000 = vmatprep.mubr.f32.mxu0 %v5348_v0 }
 0x158   : > { %3879 = vmatpush3.bf16.msra.mxu1 %v3878_v45  ;;  %v5346_v45 = vmov 0.0|0.0  }
 0x159   : > { %3499 = vmatmul.mubr.f32.gmra.mrb[38].mxu1 %v1860_v8 }
 0x15a   : > { %2001 = vmatmul.mubr.f32.gmra.mrb[6].mxu0 %v1856_v41  ;;  %3501 = vmatprep.mubr.f32.mxu1 %v1861_v13  ;;  %v2672_v41 = vld [vmem:[#allocation7 + $0xb0] sm:$0xff] }
 0x15b   : > { %2006 = vmatprep.mubr.f32.mxu0 %v5348_v0 }
 0x15d   : > { %3502 = vmatmul.mubr.f32.gmra.mrb[40].mxu1 %v1862_v54 }
 0x15e   : > { %2007 = vmatmul.mubr.f32.gmra.mrb[8].mxu0 %v1857_v9  ;;  %3504 = vmatprep.mubr.f32.mxu1 %v1863_v50  ;;  %v2673_v9 = vld [vmem:[#allocation7 + $0xb8] sm:$0xff] }
 0x15f   : > { %2012 = vmatprep.mubr.f32.mxu0 %v5348_v0 }
 0x160   : > { %v4951_v10 = vpop.f32.mrb[0].mxu1 }
 0x161   : > { %3505 = vmatmul.mubr.f32.gmra.mrb[42].mxu1 %v1864_v22  ;;  %v4953_v51 = vpop.f32.mrb[1].mxu1 }
 0x162   : > { %2013 = vmatmul.mubr.f32.gmra.mrb[10].mxu0 %v1858_v7  ;;  %3507 = vmatprep.mubr.f32.mxu1 %v1865_v19  ;;  %v3880_v7 = vpack.c.bf16 %v2673_v9, %v2672_v41  ;;  %v2274_v41 = vlaneseq }
 0x163   : > { %2018 = vmatprep.mubr.f32.mxu0 %v5348_v0 }
 0x164   : > { %v4958_v21 = vpop.f32.mrb[2].mxu1  ;;  %3881 = vmatprep.subr.bf16.mxu1 %v3880_v7  ;;  %v2275_v9 = vshrl.u32 %v2274_v41, 7 }
 0x165   : > { %3508 = vmatmul.mubr.f32.gmra.mrb[44].mxu1 %v1866_v44  ;;  %v4960_v55 = vpop.f32.mrb[3].mxu1 }
 0x166   : > { %2019 = vmatmul.mubr.f32.gmra.mrb[12].mxu0 %v1859_v46  ;;  %3510 = vmatprep.mubr.f32.mxu1 %v1867_v53  ;;  %v2656_v46 = vld [vmem:[#allocation7 + $0x30] sm:$0xff]  ;;  %v2284_v7 = vsub.s32 2, %v2275_v9 }
 0x167   : > { %2024 = vmatprep.mubr.f32.mxu0 %v5348_v0 }
 0x168   : > { %v4964_v3 = vpop.f32.mrb[4].mxu1 }
 0x169   : > { %3511 = vmatmul.mubr.f32.gmra.mrb[46].mxu1 %v1868_v56  ;;  %v4966_v37 = vpop.f32.mrb[5].mxu1 }
 0x16a   : > { %2025 = vmatmul.mubr.f32.gmra.mrb[14].mxu0 %v1860_v8  ;;  %v2657_v8 = vld [vmem:[#allocation7 + $0x38] sm:$0xff] }
 0x16b   : > { %2030 = vmatprep.mubr.f32.mxu0 %v5348_v0 }
 0x16c   : > { %v4969_v12 = vpop.f32.mrb[6].mxu1 }
 0x16d   : > { %v4971_v57 = vpop.f32.mrb[7].mxu1 }
 0x16e   : > { %2031 = vmatmul.mubr.f32.gmra.mrb[16].mxu0 %v1861_v13  ;;  %v3882_v13 = vpack.c.bf16 %v2657_v8, %v2656_v46  ;;  %v2272_v46 = vld [vmem:[%s5338_s2] sm:$0x7]  ;;  %v2276_v8 = vsub.s32 0, %v2275_v9 }
 0x16f   : > { %2036 = vmatprep.mubr.f32.mxu0 %v5348_v0 }
 0x170   : > { %v4974_v26 = vpop.f32.mrb[8].mxu1  ;;  %3883 = vmatpush3.bf16.msra.mxu1 %v3882_v13  ;;  %v5032_v13 = vrot.slane %v2272_v46, %v2284_v7 }
 0x171   : > { %v4976_v60 = vpop.f32.mrb[9].mxu1 }
 0x172   : > { %2037 = vmatmul.mubr.f32.gmra.mrb[18].mxu0 %v1862_v54  ;;  %v2674_v54 = vld [vmem:[#allocation7 + $0xc0] sm:$0xff] }
 0x173   : > { %2042 = vmatprep.mubr.f32.mxu0 %v5348_v0 }
 0x174   : > { %v4979_v17 = vpop.f32.mrb[10].mxu1 }
 0x175   : > { %v4981_v15 = vpop.f32.mrb[11].mxu1 }
 0x176   : > { %2043 = vmatmul.mubr.f32.gmra.mrb[20].mxu0 %v1863_v50  ;;  %v2675_v50 = vld [vmem:[#allocation7 + $0xc8] sm:$0xff] }
 0x177   : > { %2048 = vmatprep.mubr.f32.mxu0 %v5348_v0 }
 0x178   : > { %v4984_v61 = vpop.f32.mrb[12].mxu1 }
 0x179   : > { %v4986_v63 = vpop.f32.mrb[13].mxu1 }
 0x17a   : > { %2049 = vmatmul.mubr.f32.gmra.mrb[22].mxu0 %v1864_v22  ;;  %v3884_v22 = vpack.c.bf16 %v2675_v50, %v2674_v54  ;;  %v2280_v54 = vsub.s32 1, %v2275_v9  ;;  %v5034_v50 = vadd.s32 8, %v2275_v9 }
 0x17b   : > { %2054 = vmatprep.mubr.f32.mxu0 %v5348_v0 }
 0x17c   : > { %v4989_v34 = vpop.f32.mrb[14].mxu1  ;;  %3885 = vmatprep.subr.bf16.mxu1 %v3884_v22  ;;  %v5036_v22 = vrot.slane %v2272_v46, %v2276_v8  ;;  %vm2421_vm0 = vcmp.lt.s32.totalorder %v5034_v50, 12  ;;  %vm2419_vm1 = vcmp.lt.s32.totalorder %v5034_v50, 14  ;;  %vm2420_vm2 = vcmp.lt.s32.totalorder %v5034_v50, 13 }
 0x17d   : > { %v4991_v39 = vpop.f32.mrb[15].mxu1 }
 0x17e   : > { %2055 = vmatmul.mubr.f32.gmra.mrb[24].mxu0 %v1865_v19  ;;  %v2658_v19 = vld [vmem:[#allocation7 + $0x40] sm:$0xff] }
 0x17f   : > { %2060 = vmatprep.mubr.f32.mxu0 %v5348_v0 }
 0x180   : > { %v4994_v4 = vpop.f32.mrb[16].mxu1 }
 0x181   : > { %v4996_v47 = vpop.f32.mrb[17].mxu1 }
 0x182   : > { %2061 = vmatmul.mubr.f32.gmra.mrb[26].mxu0 %v1866_v44  ;;  %v2659_v44 = vld [vmem:[#allocation7 + $0x48] sm:$0xff] }
 0x183   : > { %2066 = vmatprep.mubr.f32.mxu0 %v5348_v0 }
 0x184   : > { %v4999_v2 = vpop.f32.mrb[18].mxu1 }
 0x185   : > { %v5001_v5 = vpop.f32.mrb[19].mxu1 }
 0x186   : > { %2067 = vmatmul.mubr.f32.gmra.mrb[28].mxu0 %v1867_v53  ;;  %v3886_v53 = vpack.c.bf16 %v2659_v44, %v2658_v19 }
 0x187   : > { %2072 = vmatprep.mubr.f32.mxu0 %v5348_v0 }
 0x188   : > { %v5004_v11 = vpop.f32.mrb[20].mxu1  ;;  %3887 = vmatpush3.bf16.msra.mxu1 %v3886_v53 }
 0x189   : > { %v5006_v18 = vpop.f32.mrb[21].mxu1 }
 0x18a   : > { %2073 = vmatmul.mubr.f32.gmra.mrb[30].mxu0 %v1868_v56  ;;  %v2676_v56 = vld [vmem:[#allocation7 + $0xd0] sm:$0xff] }
 0x18b   : > { %v3888_v32 = vpack.c.bf16 %v2677_v31, %v2676_v56  ;;  %v5039_v56 = vrot.slane %v2272_v46, %v2280_v54 }
 0x18c   : > { %v5008_v25 = vpop.f32.mrb[22].mxu1 }
 0x18d   : > { %v5010_v29 = vpop.f32.mrb[23].mxu1  ;;  %3889 = vmatprep.subr.bf16.mxu1 %v3888_v32 }
 0x18e   : > { %3891 = vmatpush3.bf16.msra.mxu1 %v3890_v35 }
 0x18f   : > { %3893 = vmatprep.subr.bf16.mxu1 %v3892_v58 }
 0x190   : > { %v5012_v16 = vpop.f32.mrb[24].mxu1 }
 0x191   : > { %v5014_v20 = vpop.f32.mrb[25].mxu1 }
 0x192   : > { %3895 = vmatpush3.bf16.msra.mxu1 %v3894_v62 }
 0x193   : > { %3897 = vmatprep.subr.bf16.mxu1 %v3896_v52 }
 0x194   : > { %v5016_v23 = vpop.f32.mrb[26].mxu1 }
 0x195   : > { %v5018_v59 = vpop.f32.mrb[27].mxu1 }
 0x196   : > { %3899 = vmatpush3.bf16.msra.mxu1 %v3898_v14 }
 0x197   : > { %3900 = vmatprep.subr.bf16.mxu1 %v5346_v45 }
 0x198   : > { %v5020_v1 = vpop.f32.mrb[28].mxu1 }
 0x199   : > { %v5022_v36 = vpop.f32.mrb[29].mxu1 }
 0x19c   : > { %v5024_v30 = vpop.f32.mrb[30].mxu1 }
 0x19d   : > { %v5026_v27 = vpop.f32.mrb[31].mxu1 }
 0x220   : > { %v3491_v19 = vpop.f32.mrb[32].mxu1 }
 0x221   : > { %v1984_v44 = vpop.f32.mrb[0].mxu0  ;;  %v2294_v53 = vadd.f32 %v3491_v19, %v5032_v13  ;;  %v2145_v31 = vpop.f32.mrb[33].mxu1 }
 0x222   : > { %v3924_v32 = vadd.f32 %v1984_v44, %v4951_v10  ;;  %v1986_v24 = vpop.f32.mrb[1].mxu0  ;;  %v2291_v33 = vadd.f32 %v5032_v13, %v2145_v31 }
 0x223   : > { %v2342_v35 = vmax.f32 %v2294_v53, 0.0  ;;  %v3925_v49 = vadd.f32 %v1986_v24, %v4953_v51 }
 0x224   : > { %v2289_v38 = vadd.f32 %v3924_v32, %v5036_v22  ;;  %v2339_v58 = vmax.f32 %v2291_v33, 0.0  ;;  %v3494_v6 = vpop.f32.mrb[34].mxu1 }
 0x225   : > { %v2439_v40 = vsel %vm2421_vm0, %v2342_v35, 0.0  ;;  %v2290_v48 = vadd.f32 %v3925_v49, %v5039_v56  ;;  %v1990_v62 = vpop.f32.mrb[2].mxu0  ;;  %v2300_v10 = vadd.f32 %v3494_v6, %v5032_v13  ;;  %v2155_v28 = vpop.f32.mrb[35].mxu1 }
 0x226   : > { %v2496_v42 = vmax.f32 %v2339_v58, %v2439_v40  ;;  %v3926_v43 = vadd.f32 %v1990_v62, %v4958_v21  ;;  %v1992_v52 = vpop.f32.mrb[3].mxu0  ;;  %v2297_v14 = vadd.f32 %v5032_v13, %v2155_v28  ;;  %v2337_v9 = vmax.f32 %v2289_v38, 0.0 }
 0x227   : > { %v2348_v51 = vmax.f32 %v2300_v10, 0.0  ;;  %v3927_v41 = vadd.f32 %v1992_v52, %v4960_v55  ;;  %v2338_v19 = vmax.f32 %v2290_v48, 0.0 }
 0x228   : > { %v2497_v7 = vrot.slane %v2496_v42, 4  ;;  %v2292_v46 = vadd.f32 %v3926_v43, %v5036_v22  ;;  %v2345_v8 = vmax.f32 %v2297_v14, 0.0  ;;  %v3497_v54 = vpop.f32.mrb[36].mxu1 }
 0x229   : > { %v2445_v21 = vsel %vm2421_vm0, %v2348_v51, 0.0  ;;  %v2293_v44 = vadd.f32 %v3927_v41, %v5039_v56  ;;  %v1996_v53 = vpop.f32.mrb[4].mxu0  ;;  %v2306_v31 = vadd.f32 %v3497_v54, %v5032_v13  ;;  %v2165_v32 = vpop.f32.mrb[37].mxu1 }
 0x22a   : > { %v2498_v24 = vmax.f32 %v2496_v42, %v2497_v7  ;;  %v2340_v55 = vmax.f32 %v2292_v46, 0.0  ;;  %v2517_v33 = vmax.f32 %v2345_v8, %v2445_v21  ;;  %v3928_v35 = vadd.f32 %v1996_v53, %v4964_v3  ;;  %v1998_v49 = vpop.f32.mrb[5].mxu0 }
 0x22b   : > { %v2341_v38 = vmax.f32 %v2293_v44, 0.0  ;;  %v2354_v58 = vmax.f32 %v2306_v31, 0.0  ;;  %v3929_v6 = vadd.f32 %v1998_v49, %v4966_v37  ;;  %v2303_v40 = vadd.f32 %v5032_v13, %v2165_v32 }
 0x22c   : > { %v2499_v48 = vrot.slane %v2498_v24, 2  ;;  %v2437_v62 = vsel %vm2419_vm1, %v2340_v55, 0.0  ;;  %v2518_v10 = vrot.slane %v2517_v33, 4  ;;  %v2295_v28 = vadd.f32 %v3928_v35, %v5036_v22  ;;  %v3500_v43 = vpop.f32.mrb[38].mxu1 }
 0x22d   : > { %v2482_v42 = vmax.f32 %v2337_v9, %v2437_v62  ;;  %v2438_v52 = vsel %vm2420_vm2, %v2341_v38, 0.0  ;;  %v2451_v3 = vsel %vm2421_vm0, %v2354_v58, 0.0  ;;  %v2296_v37 = vadd.f32 %v3929_v6, %v5039_v56  ;;  %v2002_v14 = vpop.f32.mrb[6].mxu0  ;;  %v2175_v51 = vpop.f32.mrb[39].mxu1 }
 0x22e   : > { %v2500_v41 = vmax.f32 %v2498_v24, %v2499_v48  ;;  %v2489_v7 = vmax.f32 %v2338_v19, %v2438_v52  ;;  %v2519_v46 = vmax.f32 %v2517_v33, %v2518_v10  ;;  %v2343_v8 = vmax.f32 %v2295_v28, 0.0  ;;  %v2004_v54 = vpop.f32.mrb[7].mxu0 }
 0x22f   : > { %v2483_v21 = vrot.slane %v2482_v42, 4  ;;  %v2344_v44 = vmax.f32 %v2296_v37, 0.0  ;;  %v2351_v53 = vmax.f32 %v2303_v40, 0.0  ;;  %v3930_v9 = vadd.f32 %v2002_v14, %v4969_v12 }
 0x230   : > { %v2501_v31 = vrot.slane %v2500_v41, 1  ;;  %v2490_v32 = vrot.slane %v2489_v7, 4  ;;  %v2520_v55 = vrot.slane %v2519_v46, 2  ;;  %v2312_v35 = vadd.f32 %v3500_v43, %v5032_v13  ;;  %v3503_v49 = vpop.f32.mrb[40].mxu1 }
 0x231   : > { %v2484_v38 = vmax.f32 %v2482_v42, %v2483_v21  ;;  %v2538_v58 = vmax.f32 %v2351_v53, %v2451_v3  ;;  %v2298_v6 = vadd.f32 %v3930_v9, %v5036_v22  ;;  %v3931_v19 = vadd.f32 %v2004_v54, %v4971_v57  ;;  %v2008_v24 = vpop.f32.mrb[8].mxu0  ;;  %v2185_v33 = vpop.f32.mrb[41].mxu1 }
 0x232   : > { %v2502_v48 = vmax.f32 %v2500_v41, %v2501_v31  ;;  %v2491_v62 = vmax.f32 %v2489_v7, %v2490_v32  ;;  %v2521_v10 = vmax.f32 %v2519_v46, %v2520_v55  ;;  %v2360_v40 = vmax.f32 %v2312_v35, 0.0  ;;  %v2010_v28 = vpop.f32.mrb[9].mxu0 }
 0x233   : > { %v2485_v12 = vrot.slane %v2484_v38, 2  ;;  %v2539_v52 = vrot.slane %v2538_v58, 4  ;;  %v2346_v37 = vmax.f32 %v2298_v6, 0.0  ;;  %v2299_v14 = vadd.f32 %v3931_v19, %v5039_v56 }
 0x234   : > { %v2492_v43 = vrot.slane %v2491_v62, 2  ;;  %v2522_v45 = vrot.slane %v2521_v10, 1  ;;  %v2457_v42 = vsel %vm2421_vm0, %v2360_v40, 0.0  ;;  %v2309_v3 = vadd.f32 %v5032_v13, %v2175_v51  ;;  %v3506_v57 = vpop.f32.mrb[42].mxu1 }
 0x235   : > { %v2486_v54 = vmax.f32 %v2484_v38, %v2485_v12  ;;  %v2540_v21 = vmax.f32 %v2538_v58, %v2539_v52  ;;  %v2443_v41 = vsel %vm2419_vm1, %v2346_v37, 0.0  ;;  %v2347_v7 = vmax.f32 %v2299_v14, 0.0  ;;  %v2014_v46 = vpop.f32.mrb[10].mxu0  ;;  %v2195_v53 = vpop.f32.mrb[43].mxu1 }
 0x236   : > { %v2493_v9 = vmax.f32 %v2491_v62, %v2492_v43  ;;  %v2523_v31 = vmax.f32 %v2521_v10, %v2522_v45  ;;  %v2503_v32 = vmax.f32 %v2343_v8, %v2443_v41  ;;  %v2357_v55 = vmax.f32 %v2309_v3, 0.0  ;;  %v2016_v35 = vpop.f32.mrb[11].mxu0 }
 0x237   : > { %v2487_v6 = vrot.slane %v2486_v54, 1  ;;  %v2541_v19 = vrot.slane %v2540_v21, 2  ;;  %v2444_v40 = vsel %vm2420_vm2, %v2347_v7, 0.0  ;;  %v3932_v51 = vadd.f32 %v2008_v24, %v4974_v26 }
 0x238   : > { %v2750_v38 = vsel %vm2729_vm3, %v2523_v31, %v2502_v48  ;;  %v2504_v58 = vrot.slane %v2503_v32, 4  ;;  %v2510_v12 = vmax.f32 %v2344_v44, %v2444_v40  ;;  %v5085_v52 = vpop.f32.mrb[44].mxu1  ;;  %v2494_v37 = vrot.slane %v2493_v9, 1 }
 0x239   : > { %v2542_v14 = vmax.f32 %v2540_v21, %v2541_v19  ;;  %v2559_v45 = vmax.f32 %v2357_v55, %v2457_v42  ;;  %v2020_v8 = vpop.f32.mrb[12].mxu0  ;;  %v5087_v62 = vpop.f32.mrb[45].mxu1  ;;  %v2488_v10 = vmax.f32 %v2486_v54, %v2487_v6  ;;  %v2318_v41 = vadd.f32 %v3503_v49, %v5032_v13 }
 0x23a   : > { %v2505_v43 = vmax.f32 %v2503_v32, %v2504_v58  ;;  %v2511_v3 = vrot.slane %v2510_v12, 4  ;;  %v2022_v7 = vpop.f32.mrb[13].mxu0  ;;  %v2301_v48 = vadd.f32 %v3932_v51, %v5036_v22  ;;  %v3933_v44 = vadd.f32 %v2010_v28, %v4976_v60 }
 0x23b   : > { %v2543_v26 = vrot.slane %v2542_v14, 1  ;;  %v2560_v24 = vrot.slane %v2559_v45, 4  ;;  %v2366_v21 = vmax.f32 %v2318_v41, 0.0  ;;  %v2315_v42 = vadd.f32 %v5032_v13, %v2185_v33 }
 0x23c   : > { %v2506_v31 = vrot.slane %v2505_v43, 2  ;;  %v2512_v40 = vmax.f32 %v2510_v12, %v2511_v3  ;;  %v5093_v55 = vpop.f32.mrb[46].mxu1  ;;  %v5095_v19 = vmax.f32 %v2493_v9, %v2494_v37  ;;  %v3934_v49 = vadd.f32 %v2014_v46, %v4979_v17 }
 0x23d   : > { %v2544_v54 = vmax.f32 %v2542_v14, %v2543_v26  ;;  %v2561_v32 = vmax.f32 %v2559_v45, %v2560_v24  ;;  %v5098_v6 = vpop.f32.mrb[14].mxu0  ;;  %v5100_v58 = vpop.f32.mrb[47].mxu1  ;;  %v2463_v60 = vsel %vm2421_vm0, %v2366_v21, 0.0  ;;  %v2363_v28 = vmax.f32 %v2315_v42, 0.0 }
 0x23e   : > { %v2507_v51 = vmax.f32 %v2505_v43, %v2506_v31  ;;  %v2513_v0 = vrot.slane %v2512_v40, 2  ;;  %v5104_v12 = vpop.f32.mrb[15].mxu0  ;;  %v2302_v37 = vadd.f32 %v3933_v44, %v5039_v56  ;;  %v2304_v17 = vadd.f32 %v3934_v49, %v5036_v22 }
 0x23f   : > { %v5107_v33 = vsel %vm2731_vm4, %v2544_v54, %v2750_v38  ;;  %v2562_v9 = vrot.slane %v2561_v32, 2  ;;  %v2580_v45 = vmax.f32 %v2363_v28, %v2463_v60  ;;  %v2324_v43 = vadd.f32 %v3506_v57, %v5032_v13 }
 0x240   : > { %v2508_v46 = vrot.slane %v2507_v51, 1  ;;  %v2514_v14 = vmax.f32 %v2512_v40, %v2513_v0  ;;  %v2352_v41 = vmax.f32 %v2304_v17, 0.0  ;;  %v3935_v26 = vadd.f32 %v2016_v35, %v4981_v15 }
 0x241   : > { %v2563_v3 = vmax.f32 %v2561_v32, %v2562_v9  ;;  %v2321_v24 = vadd.f32 %v5032_v13, %v2195_v53  ;;  %v5114_v31 = vpop.f32.mrb[16].mxu0  ;;  %v2349_v21 = vmax.f32 %v2301_v48, 0.0  ;;  %v2581_v42 = vrot.slane %v2580_v45, 4 }
 0x242   : > { %v2509_v38 = vmax.f32 %v2507_v51, %v2508_v46  ;;  %v2372_v54 = vmax.f32 %v2324_v43, 0.0  ;;  %v5116_v44 = vpop.f32.mrb[17].mxu0  ;;  %v2350_v49 = vmax.f32 %v2302_v37, 0.0  ;;  %v2449_v0 = vsel %vm2419_vm1, %v2352_v41, 0.0 }
 0x243   : > { %v2305_v57 = vadd.f32 %v3935_v26, %v5039_v56  ;;  %v2369_v40 = vmax.f32 %v2321_v24, 0.0  ;;  %v2515_v15 = vrot.slane %v2514_v14, 1  ;;  %v2582_v53 = vmax.f32 %v2580_v45, %v2581_v42 }
 0x244   : > { %v5122_v32 = vsel %vm2729_vm3, %v2509_v38, %v2488_v10  ;;  %v2524_v35 = vmax.f32 %v2349_v21, %v2449_v0  ;;  %v2564_v60 = vrot.slane %v2563_v3, 1  ;;  %v2469_v48 = vsel %vm2421_vm0, %v2372_v54, 0.0 }
 0x245   : > { %v2353_v51 = vmax.f32 %v2305_v57, 0.0  ;;  %v3936_v28 = vadd.f32 %v2020_v8, %v4984_v61  ;;  %v5127_v9 = vpop.f32.mrb[18].mxu0  ;;  %v2583_v37 = vrot.slane %v2582_v53, 2  ;;  %v2601_v46 = vmax.f32 %v2369_v40, %v2469_v48 }
 0x246   : > { %v2525_v17 = vrot.slane %v2524_v35, 4  ;;  %v2330_v43 = vadd.f32 %v5085_v52, %v5032_v13  ;;  %v5131_v10 = vpop.f32.mrb[19].mxu0  ;;  %v3937_v26 = vadd.f32 %v2022_v7, %v4986_v63  ;;  %v2327_v61 = vadd.f32 %v5032_v13, %v5087_v62 }
 0x247   : > { %v2450_v45 = vsel %vm2420_vm2, %v2353_v51, 0.0  ;;  %v2307_v41 = vadd.f32 %v3936_v28, %v5036_v22  ;;  %v2584_v8 = vmax.f32 %v2582_v53, %v2583_v37  ;;  %v2602_v21 = vrot.slane %v2601_v46, 4 }
 0x248   : > { %v2526_v24 = vmax.f32 %v2524_v35, %v2525_v17  ;;  %v2531_v38 = vmax.f32 %v2350_v49, %v2450_v45  ;;  %v5139_v42 = vmax.f32 %v2514_v14, %v2515_v15  ;;  %v5141_v54 = vmax.f32 %v2563_v3, %v2564_v60 }
 0x249   : > { %v2378_v52 = vmax.f32 %v2330_v43, 0.0  ;;  %v2375_v0 = vmax.f32 %v2327_v61, 0.0  ;;  %v5143_v57 = vpop.f32.mrb[20].mxu0  ;;  %v2603_v51 = vmax.f32 %v2601_v46, %v2602_v21  ;;  %v2355_v28 = vmax.f32 %v2307_v41, 0.0 }
 0x24a   : > { %v2527_v40 = vrot.slane %v2526_v24, 2  ;;  %v2532_v48 = vrot.slane %v2531_v38, 4  ;;  %v5145_v63 = vpop.f32.mrb[21].mxu0  ;;  %v2308_v7 = vadd.f32 %v3937_v26, %v5039_v56  ;;  %v3938_v14 = vadd.f32 %v5098_v6, %v4989_v34 }
 0x24b   : > { %v2475_v62 = vsel %vm2421_vm0, %v2378_v52, 0.0  ;;  %v2336_v3 = vadd.f32 %v5093_v55, %v5032_v13  ;;  %v2585_v49 = vrot.slane %v2584_v8, 1  ;;  %v2604_v35 = vrot.slane %v2603_v51, 2 }
 0x24c   : > { %v2528_v15 = vmax.f32 %v2526_v24, %v2527_v40  ;;  %v2533_v53 = vmax.f32 %v2531_v38, %v2532_v48  ;;  %v2622_v60 = vmax.f32 %v2375_v0, %v2475_v62  ;;  %v2310_v37 = vadd.f32 %v3938_v14, %v5036_v22 }
 0x24d   : > { %v2384_v17 = vmax.f32 %v2336_v3, 0.0  ;;  %v3939_v46 = vadd.f32 %v5104_v12, %v4991_v39  ;;  %v5157_v43 = vpop.f32.mrb[22].mxu0  ;;  %v2605_v26 = vmax.f32 %v2603_v51, %v2604_v35  ;;  %v2333_v34 = vadd.f32 %v5032_v13, %v5100_v58 }
 0x24e   : > { %v2529_v45 = vrot.slane %v2528_v15, 1  ;;  %v2534_v41 = vrot.slane %v2533_v53, 2  ;;  %v5161_v55 = vpop.f32.mrb[23].mxu0  ;;  %v2623_v6 = vrot.slane %v2622_v60, 4  ;;  %v2358_v61 = vmax.f32 %v2310_v37, 0.0 }
 0x24f   : > { %v2481_v24 = vsel %vm2421_vm0, %v2384_v17, 0.0  ;;  %v2311_v38 = vadd.f32 %v3939_v46, %v5039_v56  ;;  %v2606_v39 = vrot.slane %v2605_v26, 1  ;;  %v2381_v12 = vmax.f32 %v2333_v34, 0.0 }
 0x250   : > { %v2530_v21 = vmax.f32 %v2528_v15, %v2529_v45  ;;  %v2535_v52 = vmax.f32 %v2533_v53, %v2534_v41  ;;  %v2624_v0 = vmax.f32 %v2622_v60, %v2623_v6  ;;  %v2455_v40 = vsel %vm2419_vm1, %v2358_v61, 0.0 }
 0x251   : > { %v2359_v48 = vmax.f32 %v2311_v38, 0.0  ;;  %v3940_v13 = vadd.f32 %v5114_v31, %v4994_v4  ;;  %v5170_v58 = vpop.f32.mrb[24].mxu0  ;;  %v2356_v14 = vmax.f32 %v2308_v7, 0.0  ;;  %v2545_v3 = vmax.f32 %v2355_v28, %v2455_v40 }
 0x252   : > { %v5174_v51 = vsel %vm2731_vm4, %v2530_v21, %v5122_v32  ;;  %v2536_v62 = vrot.slane %v2535_v52, 1  ;;  %v2058_v15 = vpop.f32.mrb[25].mxu0  ;;  %v5176_v53 = vmax.f32 %v2584_v8, %v2585_v49  ;;  %v2625_v35 = vrot.slane %v2624_v0, 2 }
 0x253   : > { %v2456_v60 = vsel %vm2420_vm2, %v2359_v48, 0.0  ;;  %v2643_v37 = vmax.f32 %v2381_v12, %v2481_v24  ;;  %v2546_v17 = vrot.slane %v2545_v3, 4  ;;  %v2313_v4 = vadd.f32 %v3940_v13, %v5036_v22 }
 0x254   : > { %v2552_v46 = vmax.f32 %v2356_v14, %v2456_v60  ;;  %v3941_v31 = vadd.f32 %v5116_v44, %v4996_v47  ;;  %v5183_v32 = vmax.f32 %v2605_v26, %v2606_v39  ;;  %v5185_v45 = vmax.f32 %v2624_v0, %v2625_v35 }
 0x255   : > { %v2644_v28 = vrot.slane %v2643_v37, 4  ;;  %v3942_v8 = vadd.f32 %v5127_v9, %v4999_v2  ;;  %v2062_v7 = vpop.f32.mrb[26].mxu0  ;;  %v5189_v49 = vmax.f32 %v2535_v52, %v2536_v62  ;;  %v2547_v41 = vmax.f32 %v2545_v3, %v2546_v17 }
 0x256   : > { %v2553_v34 = vrot.slane %v2552_v46, 4  ;;  %v3943_v6 = vadd.f32 %v5131_v10, %v5001_v5  ;;  %v2064_v61 = vpop.f32.mrb[27].mxu0  ;;  %v2314_v47 = vadd.f32 %v3941_v31, %v5039_v56  ;;  %v3944_v26 = vadd.f32 %v5143_v57, %v5004_v11 }
 0x257   : > { %v2645_v24 = vmax.f32 %v2643_v37, %v2644_v28  ;;  %v2316_v44 = vadd.f32 %v3942_v8, %v5036_v22  ;;  %v2548_v38 = vrot.slane %v2547_v41, 2  ;;  %v2361_v2 = vmax.f32 %v2313_v4, 0.0 }
 0x258   : > { %v2554_v21 = vmax.f32 %v2552_v46, %v2553_v34  ;;  %v2317_v9 = vadd.f32 %v3943_v6, %v5039_v56  ;;  %v2627_v52 = vrot.slane %v5185_v45, 1  ;;  %v2319_v5 = vadd.f32 %v3944_v26, %v5036_v22 }
 0x259   : > { %v2646_v39 = vrot.slane %v2645_v24, 2  ;;  %v2364_v12 = vmax.f32 %v2316_v44, 0.0  ;;  %v2068_v10 = vpop.f32.mrb[28].mxu0  ;;  %v2549_v0 = vmax.f32 %v2547_v41, %v2548_v38  ;;  %v3945_v13 = vadd.f32 %v5145_v63, %v5006_v18 }
 0x25a   : > { %v2555_v40 = vrot.slane %v2554_v21, 2  ;;  %v2365_v48 = vmax.f32 %v2317_v9, 0.0  ;;  %v2070_v62 = vpop.f32.mrb[29].mxu0  ;;  %v2362_v57 = vmax.f32 %v2314_v47, 0.0  ;;  %v3946_v3 = vadd.f32 %v5157_v43, %v5008_v25 }
 0x25b   : > { %v5202_v11 = vmax.f32 %v2645_v24, %v2646_v39  ;;  %v2461_v14 = vsel %vm2419_vm1, %v2364_v12, 0.0  ;;  %v2550_v35 = vrot.slane %v2549_v0, 1  ;;  %v2367_v4 = vmax.f32 %v2319_v5, 0.0 }
 0x25c   : > { %v2556_v60 = vmax.f32 %v2554_v21, %v2555_v40  ;;  %v2566_v37 = vmax.f32 %v2361_v2, %v2461_v14  ;;  %v2462_v17 = vsel %vm2420_vm2, %v2365_v48, 0.0  ;;  %v2320_v18 = vadd.f32 %v3945_v13, %v5039_v56 }
 0x25d   : > { %v2573_v46 = vmax.f32 %v2362_v57, %v2462_v17  ;;  %v2322_v63 = vadd.f32 %v3946_v3, %v5036_v22  ;;  %v2074_v31 = vpop.f32.mrb[30].mxu0  ;;  %v2648_v8 = vrot.slane %v5202_v11, 1  ;;  %v3947_v25 = vadd.f32 %v5161_v55, %v5010_v29 }
 0x25e   : > { %v2557_v28 = vrot.slane %v2556_v60, 1  ;;  %v2567_v41 = vrot.slane %v2566_v37, 4  ;;  %v2076_v43 = vpop.f32.mrb[31].mxu0  ;;  %v5215_v34 = vmax.f32 %v2549_v0, %v2550_v35  ;;  %v3948_v47 = vadd.f32 %v5170_v58, %v5012_v16 }
 0x25f   : > { %v2574_v6 = vrot.slane %v2573_v46, 4  ;;  %v2370_v24 = vmax.f32 %v2322_v63, 0.0  ;;  %v2368_v26 = vmax.f32 %v2320_v18, 0.0  ;;  %v2323_v38 = vadd.f32 %v3947_v25, %v5039_v56 }
 0x260   : > { %v2568_v44 = vmax.f32 %v2566_v37, %v2567_v41  ;;  %v3949_v21 = vadd.f32 %v2058_v15, %v5014_v20  ;;  %v2325_v29 = vadd.f32 %v3948_v47, %v5036_v22  ;;  %v3950_v55 = vadd.f32 %v2062_v7, %v5016_v23 }
 0x261   : > { %v2575_v2 = vmax.f32 %v2573_v46, %v2574_v6  ;;  %v2467_v9 = vsel %vm2419_vm1, %v2370_v24, 0.0  ;;  %v2558_v39 = vmax.f32 %v2556_v60, %v2557_v28  ;;  %v2371_v0 = vmax.f32 %v2323_v38, 0.0 }
 0x262   : > { %v2569_v12 = vrot.slane %v2568_v44, 2  ;;  %v2587_v5 = vmax.f32 %v2367_v4, %v2467_v9  ;;  %v2326_v16 = vadd.f32 %v3949_v21, %v5039_v56  ;;  %v2328_v58 = vadd.f32 %v3950_v55, %v5036_v22 }
 0x263   : > { %v2576_v40 = vrot.slane %v2575_v2, 2  ;;  %v3951_v48 = vadd.f32 %v2064_v61, %v5018_v59  ;;  %v2468_v13 = vsel %vm2420_vm2, %v2371_v0, 0.0  ;;  %v2373_v57 = vmax.f32 %v2325_v29, 0.0 }
 0x264   : > { %v2570_v20 = vmax.f32 %v2568_v44, %v2569_v12  ;;  %v2588_v15 = vrot.slane %v2587_v5, 4  ;;  %v2594_v3 = vmax.f32 %v2368_v26, %v2468_v13  ;;  %v2376_v23 = vmax.f32 %v2328_v58, 0.0 }
 0x265   : > { %v2577_v14 = vmax.f32 %v2575_v2, %v2576_v40  ;;  %v2329_v7 = vadd.f32 %v3951_v48, %v5039_v56  ;;  %v3952_v37 = vadd.f32 %v2068_v10, %v5020_v1  ;;  %v3953_v17 = vadd.f32 %v2070_v62, %v5022_v36 }
 0x266   : > { %v2571_v35 = vrot.slane %v2570_v20, 1  ;;  %v2589_v60 = vmax.f32 %v2587_v5, %v2588_v15  ;;  %v2595_v61 = vrot.slane %v2594_v3, 4  ;;  %v2473_v46 = vsel %vm2419_vm1, %v2376_v23, 0.0 }
 0x267   : > { %v2578_v59 = vrot.slane %v2577_v14, 1  ;;  %v2377_v4 = vmax.f32 %v2329_v7, 0.0  ;;  %v2374_v63 = vmax.f32 %v2326_v16, 0.0  ;;  %v2608_v28 = vmax.f32 %v2373_v57, %v2473_v46 }
 0x268   : > { %v2590_v18 = vrot.slane %v2589_v60, 2  ;;  %v2331_v41 = vadd.f32 %v3952_v37, %v5036_v22  ;;  %v2572_v25 = vmax.f32 %v2570_v20, %v2571_v35  ;;  %v2596_v24 = vmax.f32 %v2594_v3, %v2595_v61 }
 0x269   : > { %v2579_v6 = vmax.f32 %v2577_v14, %v2578_v59  ;;  %v2474_v1 = vsel %vm2420_vm2, %v2377_v4, 0.0  ;;  %v2609_v36 = vrot.slane %v2608_v28, 4  ;;  %v2332_v47 = vadd.f32 %v3953_v17, %v5039_v56 }
 0x26a   : > { %v2591_v10 = vmax.f32 %v2589_v60, %v2590_v18  ;;  %v2615_v62 = vmax.f32 %v2374_v63, %v2474_v1  ;;  %v2597_v44 = vrot.slane %v2596_v24, 2  ;;  %v2379_v26 = vmax.f32 %v2331_v41, 0.0  ;;  %v2683_v1 = vld [vmem:[#allocation7 + $0x108] sm:$0xff] }
 0x26b   : > { %v3954_v38 = vadd.f32 %v2074_v31, %v5024_v30  ;;  %v3955_v21 = vadd.f32 %v2076_v43, %v5026_v27  ;;  %v2610_v9 = vmax.f32 %v2608_v28, %v2609_v36  ;;  %v2743_v55 = vsel %vm2729_vm3, %v5139_v42, %v5095_v19 }
 0x26c   : > { %v2592_v2 = vrot.slane %v2591_v10, 1  ;;  %v2616_v29 = vrot.slane %v2615_v62, 4  ;;  %v2598_v12 = vmax.f32 %v2596_v24, %v2597_v44  ;;  %v2744_v40 = vsel %vm2731_vm4, %v5189_v49, %v2743_v55  ;;  %v2685_v44 = vld [vmem:[#allocation7 + $0x118] sm:$0xff]  ;;  %v2688_v55 = vld [vmem:[#allocation7 + $0x130] sm:$0xff] }
 0x26d   : > { %v2334_v5 = vadd.f32 %v3954_v38, %v5036_v22  ;;  %v2335_v0 = vadd.f32 %v3955_v21, %v5039_v56  ;;  %v2611_v58 = vrot.slane %v2610_v9, 2  ;;  %v2745_v27 = vsel %vm2733_vm5, %v2558_v39, %v2744_v40  ;;  %v2691_v40 = vld [vmem:[#allocation7 + $0x148] sm:$0xff] }
 0x26e   : > { %v2593_v16 = vmax.f32 %v2591_v10, %v2592_v2  ;;  %v2617_v30 = vmax.f32 %v2615_v62, %v2616_v29  ;;  %v2599_v31 = vrot.slane %v2598_v12, 1  ;;  %v2746_v20 = vsel %vm2735_vm6, %v2579_v6, %v2745_v27  ;;  %v2686_v2 = vld [vmem:[#allocation7 + $0x120] sm:$0xff] }
 0x26f   : > { %v2382_v43 = vmax.f32 %v2334_v5, 0.0  ;;  %v2383_v48 = vmax.f32 %v2335_v0, 0.0  ;;  %v2612_v15 = vmax.f32 %v2610_v9, %v2611_v58  ;;  %v2380_v42 = vmax.f32 %v2332_v47, 0.0  ;;  %v2687_v9 = vld [vmem:[#allocation7 + $0x128] sm:$0xff]  ;;  %v2690_v0 = vld [vmem:[#allocation7 + $0x140] sm:$0xff]  ;;  %v2692_v58 = vld [vmem:[#allocation7 + $0x150] sm:$0xff] }
 0x270   : > { %v2618_v19 = vrot.slane %v2617_v30, 2  ;;  %v2734_v22 = vsel %vm2733_vm5, %v5215_v34, %v5174_v51  ;;  %v2600_v13 = vmax.f32 %v2598_v12, %v2599_v31  ;;  %v2628_v7 = vmax.f32 %v5185_v45, %v2627_v52  ;;  %v2689_v12 = vld [vmem:[#allocation7 + $0x138] sm:$0xff]  ;;  %v2694_v31 = vld [vmem:[#allocation7 + $0x160] sm:$0xff] }
 0x271   : > { %v2479_v56 = vsel %vm2419_vm1, %v2382_v43, 0.0  ;;  %v2480_v49 = vsel %vm2420_vm2, %v2383_v48, 0.0  ;;  %v2736_v39 = vsel %vm2735_vm6, %v2572_v25, %v2734_v22  ;;  %v2613_v57 = vrot.slane %v2612_v15, 1  ;;  %v2695_v43 = vld [vmem:[#allocation7 + $0x168] sm:$0xff] }
 0x272   : > { %v2619_v14 = vmax.f32 %v2617_v30, %v2618_v19  ;;  %v2629_v3 = vmax.f32 %v2379_v26, %v2479_v56  ;;  %v2636_v23 = vmax.f32 %v2380_v42, %v2480_v49  ;;  %v2747_v35 = vsel %vm2737_vm7, %v2600_v13, %v2746_v20  ;;  %v2693_v30 = vld [vmem:[#allocation7 + $0x158] sm:$0xff]  ;;  %v2696_v20 = vld [vmem:[#allocation7 + $0x170] sm:$0xff]  ;;  %v3016_v49 = vld [vmem:[%s5340_s4] ss:$0 sm:$0xff] }
 0x273   : > { %v2738_v51 = vsel %vm2737_vm7, %v2593_v16, %v2736_v39  ;;  %v2752_v50 = vsel %vm2733_vm5, %v5141_v54, %v5107_v33  ;;  %v2614_v34 = vmax.f32 %v2612_v15, %v2613_v57  ;;  %v2649_v59 = vmax.f32 %v5202_v11, %v2648_v8  ;;  %v2682_v8 = vld [vmem:[#allocation7 + $0x100] sm:$0xff]  ;;  %v2697_v15 = vld [vmem:[#allocation7 + $0x178] sm:$0xff] }
 0x274   : > { %v2630_v60 = vrot.slane %v2629_v3, 4  ;;  %v2637_v37 = vrot.slane %v2636_v23, 4  ;;  %v2620_v17 = vrot.slane %v2619_v14, 1  ;;  %v2753_v45 = vsel %vm2735_vm6, %v5176_v53, %v2752_v50 }
 0x275   : > { %v2740_v4 = vsel %vm2739_vm8, %v2614_v34, %v2738_v51  ;;  %v2754_v33 = vsel %vm2737_vm7, %v5183_v32, %v2753_v45  ;;  %v3901_v36 = vpack.c.bf16 %v2683_v1, %v2682_v8  ;;  %v2684_v32 = vld [vmem:[#allocation7 + $0x110] sm:$0xff]  ;;  %v5360_v38 = vmov 0.0  }
 0x276   : > { %v2631_v52 = vmax.f32 %v2629_v3, %v2630_v60  ;;  %v2638_v61 = vmax.f32 %v2636_v23, %v2637_v37  ;;  %v2621_v46 = vmax.f32 %v2619_v14, %v2620_v17  ;;  %v2755_v28 = vsel %vm2739_vm8, %v2628_v7, %v2754_v33 }
 0x277   : > { %v2756_v41 = vsel %vm2741_vm9, %v2649_v59, %v2755_v28  ;;  %v3904_v26 = vpack.c.bf16 %v2685_v44, %v2684_v32  ;;  %v5361_v21 = vmov 0.0|0.0   ;;  %v3907_v29 = vpack.c.bf16 %v2687_v9, %v2686_v2 }
 0x278   : > { %v2632_v54 = vrot.slane %v2631_v52, 2  ;;  %v2639_v18 = vrot.slane %v2638_v61, 2  ;;  %v2748_v63 = vsel %vm2739_vm8, %v2621_v46, %v2747_v35  ;;  %v3910_v5 = vpack.c.bf16 %v2689_v12, %v2688_v55 }
 0x279   : > { %v3913_v16 = vpack.c.bf16 %v2691_v40, %v2690_v0  ;;  %v3916_v27 = vpack.c.bf16 %v2693_v30, %v2692_v58  ;;  %v3919_v48 = vpack.c.bf16 %v2695_v43, %v2694_v31  ;;  %v3922_v19 = vpack.c.bf16 %v2697_v15, %v2696_v20 }
 0x27a   : > { %v2633_v25 = vmax.f32 %v2631_v52, %v2632_v54  ;;  %v2640_v6 = vmax.f32 %v2638_v61, %v2639_v18 }
 0x27c   : > { %v2634_v24 = vrot.slane %v2633_v25, 1  ;;  %v2641_v11 = vrot.slane %v2640_v6, 1 }
 0x27e   : > { %v2642_v53 = vmax.f32 %v2640_v6, %v2641_v11  ;;  %v2635_v10 = vmax.f32 %v2633_v25, %v2634_v24 }
 0x280   : > { %v2749_v62 = vsel %vm2741_vm9, %v2642_v53, %v2748_v63  ;;  %v2742_v47 = vsel %vm2741_vm9, %v2635_v10, %v2740_v4 }
 0x281   : > { %2824 = vmatprep.mubr.f32.mxu1 %v2749_v62 }
 0x282   : > { %2825 = vmatmul.mubr.f32.vlgmr.msra.gmra.mrb[48].mxu1 %v2742_v47 }
 0x283   : > { %3902 = vmatpush3.bf16.msra.mxu1 %v3901_v36  ;;  %3545 = vmatprep.mubr.msk.f32.mxu1 %vm4360_vm10, %v5360_v38 }
 0x284   : > { %3903 = vmatprep.subr.bf16.mxu1 %v5361_v21 }
 0x287   : > { %3905 = vmatpush3.bf16.msra.mxu1 %v3904_v26 }
 0x288   : > { %3906 = vmatprep.subr.bf16.mxu1 %v5361_v21 }
 0x28b   : > { %3908 = vmatpush3.bf16.msra.mxu1 %v3907_v29 }
 0x28c   : > { %3909 = vmatprep.subr.bf16.mxu1 %v5361_v21 }
 0x28f   : > { %3911 = vmatpush3.bf16.msra.mxu1 %v3910_v5 }
 0x290   : > { %3912 = vmatprep.subr.bf16.mxu1 %v5361_v21 }
 0x293   : > { %3914 = vmatpush3.bf16.msra.mxu1 %v3913_v16 }
 0x294   : > { %3915 = vmatprep.subr.bf16.mxu1 %v5361_v21 }
 0x297   : > { %3917 = vmatpush3.bf16.msra.mxu1 %v3916_v27 }
 0x298   : > { %3918 = vmatprep.subr.bf16.mxu1 %v5361_v21 }
 0x29b   : > { %3920 = vmatpush3.bf16.msra.mxu1 %v3919_v48 }
 0x29c   : > { %3921 = vmatprep.subr.bf16.mxu1 %v5361_v21 }
 0x29f   : > { %3923 = vmatpush3.bf16.msra.mxu1 %v3922_v19 }
 0x2a2   : > { %3546 = vmatmul.mubr.f32.vlgmr.msra.gmra.mrb[50].mxu1 %v2756_v41 }
 0x355   : > { %v3213_v42 = vpop.f32.mrb[48].mxu1 }
 0x356   : > { %v3214_v22 = vpop.f32.mrb[49].mxu1 }
 0x357   : > { %v3215_v56 = vadd.f32 %v3214_v22, %v3213_v42 }
 0x359   : > { %v2827_v13 = vadd.f32 %v3215_v56, %v3016_v49 }
 0x375   : > { %v2896_v39 = vpop.f32.mrb[50].mxu1 }
 0x376   : > { %v2897_v57 = vadd.f32 %v2896_v39, %v2827_v13  ;;  %v3547_v14 = vpop.f32.mrb[51].mxu1 }
 0x378   : > { %2900 = vst [vmem:[%s272_s15] sm:$0xff] %v2897_v57 }
 0x379   : > { %4292 = shalt.err (!%p4289_p2)
}
 0x37a   : > { %s4293_s23 = scalar_lea.hbm %s5292_s12, 128  ;;  %s4297_s13 = scalar_lea.hbm %s5341_s5, 256 }
 0x37b   : > { %p4294_p13 = scmp.ne.s32.totalorder %s5292_s12, %s4293_s23  ;;  %p4298_p4 = scmp.lt.u32.totalorder %s5292_s12, %s5341_s5 }
 0x37c   : > { %p4299_p7 = scmp.lt.u32.totalorder %s4297_s13, %s4293_s23  ;;  %p4301_p11 = scmp.lt.u32.totalorder %s4293_s23, %s5292_s12 }
 0x37d   : > { %p4295_p6 = pnand %p4294_p13, %p5362_p0 }
 0x37e   : > { %p4300_p8 = por %p4299_p7, %p4298_p4 }
 0x37f   : > { %p4296_p10 = pneg %p4295_p6 }
 0x380   : > { %p4302_p1 = por %p4301_p11, %p4300_p8 }
 0x382   : > { %p4303_p3 = pnand %p4302_p1, %p4296_p10 }
 0x384   : > { %4306 = shalt.err (!%p4303_p3)
}
 0x385   : > { %4129 = dma.vmem_to_hbm [thread:$0]  (%p5362_p0), %s5294_s30, 128, %s5292_s12, %s2902_s17  }
 0x386 PF: > { %s2927_s14 = sand.u32 1, %s4337_s18   ;;  %p5363_p5 = scmp.ne.s32.totalorder %s5350_s25, 0 }
 0x387   : > { %p5364_p9 = scmp.ge.s32.totalorder %s4349_s21, 2  ;;  %s2928_s15 = scalar_lea.sflag [#allocation4], %s2927_s14 }
 0x389   : > { %p4143_p12 = pnand %p5364_p9, %p5363_p5 }
 0x38b   : > { %4332 = dma.done.wait (!%p4143_p12), %s2928_s15, 128  }
 0x38c   : > { %4334 = vsyncadd (!%p4143_p12), %s2928_s15, 4294967168  ;;  %p19_p2 = scmp.ge.s32.totalorder %s4505_s16, 4   ;;  %s5365_s18 = smov %s4341_s19 }
 0x38d   : > { %s5366_s19 = smov %s4345_s20  ;;  %s5367_s20 = smov %s4514_s27 }
 0x38e   : > { %s5368_s21 = smov %s4505_s16  ;;  %21 = sbr.rel (!%p19_p2) target bundleno = 6 (0x6), region = 97 }
 0x395   :  { %2933 = vsyncpa [#allocation3], 1 }
 0x396   :  { %2935 = vsyncpa [#allocation3 + $0x1], 1 }
 0x397   :  { %2936 = vsyncpa [#allocation6], 1 }
 0x398   :  { %2937 = vsyncpa [#allocation4], 1 }
 0x399   :  { %2939 = vsyncpa [#allocation4 + $0x1], 1 }

</bundles_post_ra>
